<compile_context>
chip_gen: v5e
topology: v5e:2x2
jax: 0.10.0
libtpu: 0.0.40
codegen_flags: <defaults>
</compile_context>

<pallas_src>
import functools

import jax
import jax.numpy as jnp
from jax.experimental import pallas as pl
from jax.experimental.pallas import tpu as pltpu

HIDDEN = 128


def _vae_kernel(x_ref, eps_ref,
                w1_ref, b1_ref, w2_ref, b2_ref,
                wmu_ref, bmu_ref, wlv_ref, blv_ref,
                wd1_ref, bd1_ref, wd2_ref, bd2_ref, wd3_ref, bd3_ref,
                mu_out, lv_out, recon_out):
    cdt = w1_ref.dtype            # compute dtype for the big matmuls (f32 or bf16)
    f32 = jnp.float32

    # ---- encoder: Linear -> ReLU -> Linear -> ReLU (f32 accumulation) ----
    x = x_ref[...].astype(cdt)                      # cast in-kernel (free, hidden under matmul)
    h = jnp.dot(x, w1_ref[...], preferred_element_type=f32) + b1_ref[...]
    h = jnp.maximum(h, 0.0)
    h = jnp.dot(h.astype(cdt), w2_ref[...], preferred_element_type=f32) + b2_ref[...]
    h = jnp.maximum(h, 0.0)                         # feat, f32

    # ---- mu / logvar heads (kept f32 even on the bf16 path; they are tiny) ----
    mu = jnp.dot(h, wmu_ref[...], preferred_element_type=f32) + bmu_ref[...]
    logvar = jnp.dot(h, wlv_ref[...], preferred_element_type=f32) + blv_ref[...]

    # ---- reparameterize: z = mu + eps * exp(0.5 * logvar) ----
    std = jnp.exp(0.5 * logvar)
    z = mu + eps_ref[...] * std

    # ---- decoder: Linear -> ReLU -> Linear -> ReLU -> Linear ----
    d = jnp.dot(z.astype(cdt), wd1_ref[...], preferred_element_type=f32) + bd1_ref[...]
    d = jnp.maximum(d, 0.0)
    d = jnp.dot(d.astype(cdt), wd2_ref[...], preferred_element_type=f32) + bd2_ref[...]
    d = jnp.maximum(d, 0.0)
    recon = jnp.dot(d.astype(cdt), wd3_ref[...], preferred_element_type=f32) + bd3_ref[...]

    # ---- stores at true widths (narrow, but tiny vs. padded-slab DMA) ----
    mu_out[...] = mu.astype(mu_out.dtype)
    lv_out[...] = logvar.astype(lv_out.dtype)
    recon_out[...] = recon.astype(recon_out.dtype)


def _pick_block_b(B, requested=None, max_rows=4096):
    """Pick a batch tile: whole batch (grid=1) when it fits, else a divisor of B
    that is a multiple of 8 (sublane quantum).  Always legal."""
    bb = min(B, max_rows if requested is None else requested)
    if bb >= B:
        return B
    for cand in range(bb, 7, -1):
        if B % cand == 0 and cand % 8 == 0:
            return cand
    return B


@functools.partial(jax.jit, static_argnames=("block_b",))
def _vae_forward_jit(x, eps, packed_params, *, block_b):
    B, x_dim = x.shape
    z_dim = eps.shape[1]

    grid = (B // block_b,)

    def batch_spec(feat):
        return pl.BlockSpec((block_b, feat), lambda i: (i, 0))

    # weights / biases: whole array resident in VMEM (single DMA, no
    # per-step double buffering).
    resident = pl.BlockSpec(memory_space=pltpu.MemorySpace.VMEM)

    in_specs = [
        batch_spec(x_dim),          # x
        batch_spec(z_dim),          # eps (true width)
    ] + [resident] * 14             # w1,b1,w2,b2,wmu,bmu,wlv,blv,wd1,bd1,wd2,bd2,wd3,bd3

    out_specs = [
        batch_spec(z_dim),          # mu
        batch_spec(z_dim),          # logvar
        batch_spec(x_dim),          # recon
    ]
    out_shape = [
        jax.ShapeDtypeStruct((B, z_dim), jnp.float32),
        jax.ShapeDtypeStruct((B, z_dim), jnp.float32),
        jax.ShapeDtypeStruct((B, x_dim), jnp.float32),
    ]

    mu, logvar, recon = pl.pallas_call(
        _vae_kernel,
        out_shape=out_shape,
        grid_spec=pltpu.PrefetchScalarGridSpec(
            num_scalar_prefetch=0,
            grid=grid,
            in_specs=in_specs,
            out_specs=out_specs,
        ),
        compiler_params=pltpu.CompilerParams(
            dimension_semantics=("parallel",)),
    )(x, eps, *packed_params)
    return mu, logvar, recon


def vae_forward(x, eps, packed_params, block_b=None):
    """VAE forward.  x: [B, x_dim] f32, eps: [B, z_dim] f32.
    packed_params: output of pack_vae_params.  Returns (mu, logvar, recon)."""
    bb = _pick_block_b(x.shape[0], block_b)
    return _vae_forward_jit(x, eps, packed_params, block_b=bb)


def pack_vae_params(params, compute_dtype=jnp.float32):
    """One-time packing: cast the big matmul weights to the compute dtype.
    Biases and the tiny mu/logvar head weights stay f32 (f32 accumulation /
    head precision).  Call once; pass the result to vae_forward."""
    (w1, b1, w2, b2, wmu, bmu, wlv, blv, wd1, bd1, wd2, bd2, wd3, bd3) = params
    cdt = compute_dtype
    return (w1.astype(cdt), b1, w2.astype(cdt), b2,
            wmu, bmu, wlv, blv,
            wd1.astype(cdt), bd1, wd2.astype(cdt), bd2, wd3.astype(cdt), bd3)


def init_linear(key, fan_in, fan_out):
    """nn.Linear-style U(-1/sqrt(fan_in), 1/sqrt(fan_in)); weight stored transposed."""
    kw, kb = jax.random.split(key)
    bound = 1.0 / jnp.sqrt(jnp.float32(fan_in))
    w = jax.random.uniform(kw, (fan_in, fan_out), jnp.float32, -bound, bound)
    b = jax.random.uniform(kb, (1, fan_out), jnp.float32, -bound, bound)
    return w, b


def init_vae_params(key, x_dim, z_dim):
    keys = jax.random.split(key, 7)
    w1, b1 = init_linear(keys[0], x_dim, HIDDEN)      # fc_feat_x[0]
    w2, b2 = init_linear(keys[1], HIDDEN, HIDDEN)     # fc_feat_x[2]
    wmu, bmu = init_linear(keys[2], HIDDEN, z_dim)    # fc_mu
    wlv, blv = init_linear(keys[3], HIDDEN, z_dim)    # fc_logvar
    wd1, bd1 = init_linear(keys[4], z_dim, HIDDEN)    # dec[0]
    wd2, bd2 = init_linear(keys[5], HIDDEN, HIDDEN)   # dec[2]
    wd3, bd3 = init_linear(keys[6], HIDDEN, x_dim)    # dec[4]
    return (w1, b1, w2, b2, wmu, bmu, wlv, blv, wd1, bd1, wd2, bd2, wd3, bd3)


def vae_forward_ref(x, eps, params):
    """Plain-JAX reference of the same forward pass (for validation)."""
    (w1, b1, w2, b2, wmu, bmu, wlv, blv, wd1, bd1, wd2, bd2, wd3, bd3) = params
    hi = jax.lax.Precision.HIGHEST
    mm = lambda a, b: jnp.dot(a, b, precision=hi)
    h = jnp.maximum(mm(x, w1) + b1, 0.0)
    h = jnp.maximum(mm(h, w2) + b2, 0.0)
    mu = mm(h, wmu) + bmu
    logvar = mm(h, wlv) + blv
    z = mu + eps * jnp.exp(0.5 * logvar)
    d = jnp.maximum(mm(z, wd1) + bd1, 0.0)
    d = jnp.maximum(mm(d, wd2) + bd2, 0.0)
    recon = mm(d, wd3) + bd3
    return mu, logvar, recon


if __name__ == "__main__":
    B, X_DIM, Z_DIM = 256, 32, 8

    root = jax.random.PRNGKey(0)
    k_params, k_x, k_eps = jax.random.split(root, 3)

    params = init_vae_params(k_params, X_DIM, Z_DIM)
    x = jax.random.normal(k_x, (B, X_DIM), jnp.float32)
    # TODO(synk): torch.randn_like(std) has no in-kernel equivalent that matches
    # torch's RNG stream; eps is supplied explicitly as an input instead.
    eps = jax.random.normal(k_eps, (B, Z_DIM), jnp.float32)

    mu_r, logvar_r, recon_r = vae_forward_ref(x, eps, params)

    # ---- f32 path (exact semantics) ----
    packed_f32 = pack_vae_params(params, jnp.float32)
    mu, logvar, recon = vae_forward(x, eps, packed_f32)
    jax.block_until_ready((mu, logvar, recon))

    assert mu.shape == (B, Z_DIM) and logvar.shape == (B, Z_DIM) and recon.shape == (B, X_DIM)
    assert jnp.allclose(mu, mu_r, atol=1e-4, rtol=1e-4), "mu mismatch (f32)"
    assert jnp.allclose(logvar, logvar_r, atol=1e-4, rtol=1e-4), "logvar mismatch (f32)"
    assert jnp.allclose(recon, recon_r, atol=1e-4, rtol=1e-4), "recon mismatch (f32)"

    # ---- bf16 compute path (bf16 MXU inputs, f32 accumulation; all chips) ----
    packed_bf16 = pack_vae_params(params, jnp.bfloat16)
    mu_b, logvar_b, recon_b = vae_forward(x, eps, packed_bf16)
    jax.block_until_ready((mu_b, logvar_b, recon_b))
    assert jnp.allclose(mu_b, mu_r, atol=0.15, rtol=0.05), "mu mismatch (bf16)"
    assert jnp.allclose(logvar_b, logvar_r, atol=0.15, rtol=0.05), "logvar mismatch (bf16)"
    assert jnp.allclose(recon_b, recon_r, atol=0.2, rtol=0.05), "recon mismatch (bf16)"

    print("KERNEL_OK")
</pallas_src>

<mosaic_0001>
module attributes {stable_mosaic.version = 11 : i64} {
  func.func @_vae_kernel(%arg0: i32, %arg1: memref<256x32xf32, #tpu.memory_space<vmem>>, %arg2: memref<256x8xf32, #tpu.memory_space<vmem>>, %arg3: memref<32x128xf32, #tpu.memory_space<vmem>>, %arg4: memref<1x128xf32, #tpu.memory_space<vmem>>, %arg5: memref<128x128xf32, #tpu.memory_space<vmem>>, %arg6: memref<1x128xf32, #tpu.memory_space<vmem>>, %arg7: memref<128x8xf32, #tpu.memory_space<vmem>>, %arg8: memref<1x8xf32, #tpu.memory_space<vmem>>, %arg9: memref<128x8xf32, #tpu.memory_space<vmem>>, %arg10: memref<1x8xf32, #tpu.memory_space<vmem>>, %arg11: memref<8x128xf32, #tpu.memory_space<vmem>>, %arg12: memref<1x128xf32, #tpu.memory_space<vmem>>, %arg13: memref<128x128xf32, #tpu.memory_space<vmem>>, %arg14: memref<1x128xf32, #tpu.memory_space<vmem>>, %arg15: memref<128x32xf32, #tpu.memory_space<vmem>>, %arg16: memref<1x32xf32, #tpu.memory_space<vmem>>, %arg17: memref<256x8xf32, #tpu.memory_space<vmem>>, %arg18: memref<256x8xf32, #tpu.memory_space<vmem>>, %arg19: memref<256x32xf32, #tpu.memory_space<vmem>>) attributes {dimension_semantics = [#tpu.dimension_semantics<parallel>], iteration_bounds = array<i64: 1>, scalar_prefetch = 0 : i64, scratch_operands = 0 : i64, tpu.core_type = #tpu.core_type<tc>, window_params = [{transform_indices = @transform_0, window_bounds = array<i64: 256, 32>}, {transform_indices = @transform_1, window_bounds = array<i64: 256, 8>}, {pipeline_mode = #tpu.pipeline_mode<synchronous>, transform_indices = @transform_2, window_bounds = array<i64: 32, 128>}, {pipeline_mode = #tpu.pipeline_mode<synchronous>, transform_indices = @transform_3, window_bounds = array<i64: 1, 128>}, {pipeline_mode = #tpu.pipeline_mode<synchronous>, transform_indices = @transform_4, window_bounds = array<i64: 128, 128>}, {pipeline_mode = #tpu.pipeline_mode<synchronous>, transform_indices = @transform_5, window_bounds = array<i64: 1, 128>}, {pipeline_mode = #tpu.pipeline_mode<synchronous>, transform_indices = @transform_6, window_bounds = array<i64: 128, 8>}, {pipeline_mode = #tpu.pipeline_mode<synchronous>, transform_indices = @transform_7, window_bounds = array<i64: 1, 8>}, {pipeline_mode = #tpu.pipeline_mode<synchronous>, transform_indices = @transform_8, window_bounds = array<i64: 128, 8>}, {pipeline_mode = #tpu.pipeline_mode<synchronous>, transform_indices = @transform_9, window_bounds = array<i64: 1, 8>}, {pipeline_mode = #tpu.pipeline_mode<synchronous>, transform_indices = @transform_10, window_bounds = array<i64: 8, 128>}, {pipeline_mode = #tpu.pipeline_mode<synchronous>, transform_indices = @transform_11, window_bounds = array<i64: 1, 128>}, {pipeline_mode = #tpu.pipeline_mode<synchronous>, transform_indices = @transform_12, window_bounds = array<i64: 128, 128>}, {pipeline_mode = #tpu.pipeline_mode<synchronous>, transform_indices = @transform_13, window_bounds = array<i64: 1, 128>}, {pipeline_mode = #tpu.pipeline_mode<synchronous>, transform_indices = @transform_14, window_bounds = array<i64: 128, 32>}, {pipeline_mode = #tpu.pipeline_mode<synchronous>, transform_indices = @transform_15, window_bounds = array<i64: 1, 32>}, {transform_indices = @transform_16, window_bounds = array<i64: 256, 8>}, {transform_indices = @transform_17, window_bounds = array<i64: 256, 8>}, {transform_indices = @transform_18, window_bounds = array<i64: 256, 32>}]} {
    %c0 = arith.constant 0 : index
    %c0_0 = arith.constant 0 : index
    %0 = vector.load %arg1[%c0, %c0_0] : memref<256x32xf32, #tpu.memory_space<vmem>>, vector<256x32xf32>
    %c0_1 = arith.constant 0 : index
    %c0_2 = arith.constant 0 : index
    %1 = vector.load %arg3[%c0_1, %c0_2] : memref<32x128xf32, #tpu.memory_space<vmem>>, vector<32x128xf32>
    %cst = arith.constant dense<0.000000e+00> : vector<256x128xf32>
    %2 = tpu.matmul %0, %1, %cst {dimension_numbers = #tpu.dot_dimension_numbers<[1], [0], [0], [1], [0, 0, 1, 1], [], []>} : vector<256x32xf32>, vector<32x128xf32>, vector<256x128xf32> -> vector<256x128xf32>
    %c0_3 = arith.constant 0 : index
    %c0_4 = arith.constant 0 : index
    %3 = vector.load %arg4[%c0_3, %c0_4] : memref<1x128xf32, #tpu.memory_space<vmem>>, vector<1x128xf32>
    %4 = vector.broadcast %3 : vector<1x128xf32> to vector<256x128xf32>
    %5 = arith.addf %2, %4 : vector<256x128xf32>
    %cst_5 = arith.constant 0.000000e+00 : f32
    %6 = vector.broadcast %cst_5 : f32 to vector<256x128xf32>
    %7 = arith.maximumf %5, %6 : vector<256x128xf32>
    %c0_6 = arith.constant 0 : index
    %c0_7 = arith.constant 0 : index
    %8 = vector.load %arg5[%c0_6, %c0_7] : memref<128x128xf32, #tpu.memory_space<vmem>>, vector<128x128xf32>
    %cst_8 = arith.constant dense<0.000000e+00> : vector<256x128xf32>
    %9 = tpu.matmul %7, %8, %cst_8 {dimension_numbers = #tpu.dot_dimension_numbers<[1], [0], [0], [1], [0, 0, 1, 1], [], []>} : vector<256x128xf32>, vector<128x128xf32>, vector<256x128xf32> -> vector<256x128xf32>
    %c0_9 = arith.constant 0 : index
    %c0_10 = arith.constant 0 : index
    %10 = vector.load %arg6[%c0_9, %c0_10] : memref<1x128xf32, #tpu.memory_space<vmem>>, vector<1x128xf32>
    %11 = vector.broadcast %10 : vector<1x128xf32> to vector<256x128xf32>
    %12 = arith.addf %9, %11 : vector<256x128xf32>
    %cst_11 = arith.constant 0.000000e+00 : f32
    %13 = vector.broadcast %cst_11 : f32 to vector<256x128xf32>
    %14 = arith.maximumf %12, %13 : vector<256x128xf32>
    %c0_12 = arith.constant 0 : index
    %c0_13 = arith.constant 0 : index
    %15 = vector.load %arg7[%c0_12, %c0_13] : memref<128x8xf32, #tpu.memory_space<vmem>>, vector<128x8xf32>
    %cst_14 = arith.constant dense<0.000000e+00> : vector<256x8xf32>
    %16 = tpu.matmul %14, %15, %cst_14 {dimension_numbers = #tpu.dot_dimension_numbers<[1], [0], [0], [1], [0, 0, 1, 1], [], []>} : vector<256x128xf32>, vector<128x8xf32>, vector<256x8xf32> -> vector<256x8xf32>
    %c0_15 = arith.constant 0 : index
    %c0_16 = arith.constant 0 : index
    %17 = vector.load %arg8[%c0_15, %c0_16] : memref<1x8xf32, #tpu.memory_space<vmem>>, vector<1x8xf32>
    %18 = vector.broadcast %17 : vector<1x8xf32> to vector<256x8xf32>
    %19 = arith.addf %16, %18 : vector<256x8xf32>
    %c0_17 = arith.constant 0 : index
    %c0_18 = arith.constant 0 : index
    %20 = vector.load %arg9[%c0_17, %c0_18] : memref<128x8xf32, #tpu.memory_space<vmem>>, vector<128x8xf32>
    %cst_19 = arith.constant dense<0.000000e+00> : vector<256x8xf32>
    %21 = tpu.matmul %14, %20, %cst_19 {dimension_numbers = #tpu.dot_dimension_numbers<[1], [0], [0], [1], [0, 0, 1, 1], [], []>} : vector<256x128xf32>, vector<128x8xf32>, vector<256x8xf32> -> vector<256x8xf32>
    %c0_20 = arith.constant 0 : index
    %c0_21 = arith.constant 0 : index
    %22 = vector.load %arg10[%c0_20, %c0_21] : memref<1x8xf32, #tpu.memory_space<vmem>>, vector<1x8xf32>
    %23 = vector.broadcast %22 : vector<1x8xf32> to vector<256x8xf32>
    %24 = arith.addf %21, %23 : vector<256x8xf32>
    %cst_22 = arith.constant 5.000000e-01 : f32
    %25 = vector.broadcast %cst_22 : f32 to vector<256x8xf32>
    %26 = arith.mulf %25, %24 : vector<256x8xf32>
    %27 = math.exp %26 : vector<256x8xf32>
    %c0_23 = arith.constant 0 : index
    %c0_24 = arith.constant 0 : index
    %28 = vector.load %arg2[%c0_23, %c0_24] : memref<256x8xf32, #tpu.memory_space<vmem>>, vector<256x8xf32>
    %29 = arith.mulf %28, %27 : vector<256x8xf32>
    %30 = arith.addf %19, %29 : vector<256x8xf32>
    %c0_25 = arith.constant 0 : index
    %c0_26 = arith.constant 0 : index
    %31 = vector.load %arg11[%c0_25, %c0_26] : memref<8x128xf32, #tpu.memory_space<vmem>>, vector<8x128xf32>
    %cst_27 = arith.constant dense<0.000000e+00> : vector<256x128xf32>
    %32 = tpu.matmul %30, %31, %cst_27 {dimension_numbers = #tpu.dot_dimension_numbers<[1], [0], [0], [1], [0, 0, 1, 1], [], []>} : vector<256x8xf32>, vector<8x128xf32>, vector<256x128xf32> -> vector<256x128xf32>
    %c0_28 = arith.constant 0 : index
    %c0_29 = arith.constant 0 : index
    %33 = vector.load %arg12[%c0_28, %c0_29] : memref<1x128xf32, #tpu.memory_space<vmem>>, vector<1x128xf32>
    %34 = vector.broadcast %33 : vector<1x128xf32> to vector<256x128xf32>
    %35 = arith.addf %32, %34 : vector<256x128xf32>
    %cst_30 = arith.constant 0.000000e+00 : f32
    %36 = vector.broadcast %cst_30 : f32 to vector<256x128xf32>
    %37 = arith.maximumf %35, %36 : vector<256x128xf32>
    %c0_31 = arith.constant 0 : index
    %c0_32 = arith.constant 0 : index
    %38 = vector.load %arg13[%c0_31, %c0_32] : memref<128x128xf32, #tpu.memory_space<vmem>>, vector<128x128xf32>
    %cst_33 = arith.constant dense<0.000000e+00> : vector<256x128xf32>
    %39 = tpu.matmul %37, %38, %cst_33 {dimension_numbers = #tpu.dot_dimension_numbers<[1], [0], [0], [1], [0, 0, 1, 1], [], []>} : vector<256x128xf32>, vector<128x128xf32>, vector<256x128xf32> -> vector<256x128xf32>
    %c0_34 = arith.constant 0 : index
    %c0_35 = arith.constant 0 : index
    %40 = vector.load %arg14[%c0_34, %c0_35] : memref<1x128xf32, #tpu.memory_space<vmem>>, vector<1x128xf32>
    %41 = vector.broadcast %40 : vector<1x128xf32> to vector<256x128xf32>
    %42 = arith.addf %39, %41 : vector<256x128xf32>
    %cst_36 = arith.constant 0.000000e+00 : f32
    %43 = vector.broadcast %cst_36 : f32 to vector<256x128xf32>
    %44 = arith.maximumf %42, %43 : vector<256x128xf32>
    %c0_37 = arith.constant 0 : index
    %c0_38 = arith.constant 0 : index
    %45 = vector.load %arg15[%c0_37, %c0_38] : memref<128x32xf32, #tpu.memory_space<vmem>>, vector<128x32xf32>
    %cst_39 = arith.constant dense<0.000000e+00> : vector<256x32xf32>
    %46 = tpu.matmul %44, %45, %cst_39 {dimension_numbers = #tpu.dot_dimension_numbers<[1], [0], [0], [1], [0, 0, 1, 1], [], []>} : vector<256x128xf32>, vector<128x32xf32>, vector<256x32xf32> -> vector<256x32xf32>
    %c0_40 = arith.constant 0 : index
    %c0_41 = arith.constant 0 : index
    %47 = vector.load %arg16[%c0_40, %c0_41] : memref<1x32xf32, #tpu.memory_space<vmem>>, vector<1x32xf32>
    %48 = vector.broadcast %47 : vector<1x32xf32> to vector<256x32xf32>
    %49 = arith.addf %46, %48 : vector<256x32xf32>
    %c0_42 = arith.constant 0 : index
    %c0_43 = arith.constant 0 : index
    %50 = vector.load %arg17[%c0_42, %c0_43] : memref<256x8xf32, #tpu.memory_space<vmem>>, vector<256x8xf32>
    tpu.vector_store %arg17[%c0_42, %c0_43], %19 {strides = array<i32>} : memref<256x8xf32, #tpu.memory_space<vmem>>, vector<256x8xf32>,
    %c0_44 = arith.constant 0 : index
    %c0_45 = arith.constant 0 : index
    %51 = vector.load %arg18[%c0_44, %c0_45] : memref<256x8xf32, #tpu.memory_space<vmem>>, vector<256x8xf32>
    tpu.vector_store %arg18[%c0_44, %c0_45], %24 {strides = array<i32>} : memref<256x8xf32, #tpu.memory_space<vmem>>, vector<256x8xf32>,
    %c0_46 = arith.constant 0 : index
    %c0_47 = arith.constant 0 : index
    %52 = vector.load %arg19[%c0_46, %c0_47] : memref<256x32xf32, #tpu.memory_space<vmem>>, vector<256x32xf32>
    tpu.vector_store %arg19[%c0_46, %c0_47], %49 {strides = array<i32>} : memref<256x32xf32, #tpu.memory_space<vmem>>, vector<256x32xf32>,
    return
  }
  func.func @transform_0(%arg0: i32) -> (i32, i32) {
    %c0_i32 = arith.constant 0 : i32
    %c0_i32_0 = arith.constant 0 : i32
    return %arg0, %c0_i32 : i32, i32
  }
  func.func @transform_1(%arg0: i32) -> (i32, i32) {
    %c0_i32 = arith.constant 0 : i32
    %c0_i32_0 = arith.constant 0 : i32
    return %arg0, %c0_i32 : i32, i32
  }
  func.func @transform_2(%arg0: i32) -> (i32, i32) {
    %c0_i32 = arith.constant 0 : i32
    %c0_i32_0 = arith.constant 0 : i32
    %c0_i32_1 = arith.constant 0 : i32
    return %c0_i32, %c0_i32_0 : i32, i32
  }
  func.func @transform_3(%arg0: i32) -> (i32, i32) {
    %c0_i32 = arith.constant 0 : i32
    %c0_i32_0 = arith.constant 0 : i32
    %c0_i32_1 = arith.constant 0 : i32
    return %c0_i32, %c0_i32_0 : i32, i32
  }
  func.func @transform_4(%arg0: i32) -> (i32, i32) {
    %c0_i32 = arith.constant 0 : i32
    %c0_i32_0 = arith.constant 0 : i32
    %c0_i32_1 = arith.constant 0 : i32
    return %c0_i32, %c0_i32_0 : i32, i32
  }
  func.func @transform_5(%arg0: i32) -> (i32, i32) {
    %c0_i32 = arith.constant 0 : i32
    %c0_i32_0 = arith.constant 0 : i32
    %c0_i32_1 = arith.constant 0 : i32
    return %c0_i32, %c0_i32_0 : i32, i32
  }
  func.func @transform_6(%arg0: i32) -> (i32, i32) {
    %c0_i32 = arith.constant 0 : i32
    %c0_i32_0 = arith.constant 0 : i32
    %c0_i32_1 = arith.constant 0 : i32
    return %c0_i32, %c0_i32_0 : i32, i32
  }
  func.func @transform_7(%arg0: i32) -> (i32, i32) {
    %c0_i32 = arith.constant 0 : i32
    %c0_i32_0 = arith.constant 0 : i32
    %c0_i32_1 = arith.constant 0 : i32
    return %c0_i32, %c0_i32_0 : i32, i32
  }
  func.func @transform_8(%arg0: i32) -> (i32, i32) {
    %c0_i32 = arith.constant 0 : i32
    %c0_i32_0 = arith.constant 0 : i32
    %c0_i32_1 = arith.constant 0 : i32
    return %c0_i32, %c0_i32_0 : i32, i32
  }
  func.func @transform_9(%arg0: i32) -> (i32, i32) {
    %c0_i32 = arith.constant 0 : i32
    %c0_i32_0 = arith.constant 0 : i32
    %c0_i32_1 = arith.constant 0 : i32
    return %c0_i32, %c0_i32_0 : i32, i32
  }
  func.func @transform_10(%arg0: i32) -> (i32, i32) {
    %c0_i32 = arith.constant 0 : i32
    %c0_i32_0 = arith.constant 0 : i32
    %c0_i32_1 = arith.constant 0 : i32
    return %c0_i32, %c0_i32_0 : i32, i32
  }
  func.func @transform_11(%arg0: i32) -> (i32, i32) {
    %c0_i32 = arith.constant 0 : i32
    %c0_i32_0 = arith.constant 0 : i32
    %c0_i32_1 = arith.constant 0 : i32
    return %c0_i32, %c0_i32_0 : i32, i32
  }
  func.func @transform_12(%arg0: i32) -> (i32, i32) {
    %c0_i32 = arith.constant 0 : i32
    %c0_i32_0 = arith.constant 0 : i32
    %c0_i32_1 = arith.constant 0 : i32
    return %c0_i32, %c0_i32_0 : i32, i32
  }
  func.func @transform_13(%arg0: i32) -> (i32, i32) {
    %c0_i32 = arith.constant 0 : i32
    %c0_i32_0 = arith.constant 0 : i32
    %c0_i32_1 = arith.constant 0 : i32
    return %c0_i32, %c0_i32_0 : i32, i32
  }
  func.func @transform_14(%arg0: i32) -> (i32, i32) {
    %c0_i32 = arith.constant 0 : i32
    %c0_i32_0 = arith.constant 0 : i32
    %c0_i32_1 = arith.constant 0 : i32
    return %c0_i32, %c0_i32_0 : i32, i32
  }
  func.func @transform_15(%arg0: i32) -> (i32, i32) {
    %c0_i32 = arith.constant 0 : i32
    %c0_i32_0 = arith.constant 0 : i32
    %c0_i32_1 = arith.constant 0 : i32
    return %c0_i32, %c0_i32_0 : i32, i32
  }
  func.func @transform_16(%arg0: i32) -> (i32, i32) {
    %c0_i32 = arith.constant 0 : i32
    %c0_i32_0 = arith.constant 0 : i32
    return %arg0, %c0_i32 : i32, i32
  }
  func.func @transform_17(%arg0: i32) -> (i32, i32) {
    %c0_i32 = arith.constant 0 : i32
    %c0_i32_0 = arith.constant 0 : i32
    return %arg0, %c0_i32 : i32, i32
  }
  func.func @transform_18(%arg0: i32) -> (i32, i32) {
    %c0_i32 = arith.constant 0 : i32
    %c0_i32_0 = arith.constant 0 : i32
    return %arg0, %c0_i32 : i32, i32
  }
}

</mosaic_0001>

<bundles_post_ra>
// kernel: _vae_forward_jit.1
= control target key start
LH: loop header
LB: loop body
LE: loop exit
PB: predicated region body
PF: predicated region fallthrough
CT: control target
= control target key end

     0   :  { %vm96_vm0 = vcmask 261120   ;;  %vm966_vm1 = vcmask 64512   ;;  %s3402_s2 = inlined_call_operand.vmem [shape: f32[32,128], index: 2, kind: input, shape index: {}]   ;;  %s3403_s0 = inlined_call_operand.vmem [shape: f32[256,32], index: 0, kind: input, shape index: {}]   ;;  %s3404_s3 = inlined_call_operand.vmem [shape: f32[1,128], index: 3, kind: input, shape index: {}]   ;;  %s3405_s4 = inlined_call_operand.vmem [shape: f32[128,128], index: 4, kind: input, shape index: {}]   ;;  %s3406_s5 = inlined_call_operand.vmem [shape: f32[1,128], index: 5, kind: input, shape index: {}]   ;;  %s3407_s6 = inlined_call_operand.vmem [shape: f32[128,8], index: 6, kind: input, shape index: {}]   ;;  %s3408_s7 = inlined_call_operand.vmem [shape: f32[1,8], index: 7, kind: input, shape index: {}]   ;;  %s3409_s16 = inlined_call_operand.vmem [shape: f32[256,8], index: 16, kind: output, shape index: {0}]   ;;  %s3410_s8 = inlined_call_operand.vmem [shape: f32[128,8], index: 8, kind: input, shape index: {}]   ;;  %s3411_s10 = inlined_call_operand.vmem [shape: f32[8,128], index: 10, kind: input, shape index: {}]   ;;  %s3412_s9 = inlined_call_operand.vmem [shape: f32[1,8], index: 9, kind: input, shape index: {}]   ;;  %s3413_s12 = inlined_call_operand.vmem [shape: f32[128,128], index: 12, kind: input, shape index: {}]   ;;  %s3414_s17 = inlined_call_operand.vmem [shape: f32[256,8], index: 17, kind: output, shape index: {1}]   ;;  %s3415_s1 = inlined_call_operand.vmem [shape: f32[256,8], index: 1, kind: input, shape index: {}]   ;;  %s3416_s11 = inlined_call_operand.vmem [shape: f32[1,128], index: 11, kind: input, shape index: {}]   ;;  %s3417_s14 = inlined_call_operand.vmem [shape: f32[128,32], index: 14, kind: input, shape index: {}]   ;;  %s3418_s13 = inlined_call_operand.vmem [shape: f32[1,128], index: 13, kind: input, shape index: {}]   ;;  %s3419_s15 = inlined_call_operand.vmem [shape: f32[1,32], index: 15, kind: input, shape index: {}]   ;;  %s3420_s18 = inlined_call_operand.vmem [shape: f32[256,32], index: 18, kind: output, shape index: {2}]  }
   0x1   :  { %3445 = sst [smem:[#allocation2_spill]] %s3402_s2  ;;  %v353_v13 = vld [vmem:[%s3405_s4 + $0x78] sm:$0xff]  ;;  %v352_v14 = vld [vmem:[%s3405_s4 + $0x70] sm:$0xff]  ;;  %v351_v15 = vld [vmem:[%s3405_s4 + $0x68] sm:$0xff] }
   0x2   :  { %3446 = sst [smem:[#allocation3_spill]] %s3403_s0  ;;  %358 = vmatpush.msra.mxu1 %v353_v13  ;;  %v350_v17 = vld [vmem:[%s3405_s4 + $0x60] sm:$0xff]  ;;  %v349_v18 = vld [vmem:[%s3405_s4 + $0x58] sm:$0xff]  ;;  %v348_v19 = vld [vmem:[%s3405_s4 + $0x50] sm:$0xff] }
   0x3   :  { %3447 = sst [smem:[#allocation4_spill]] %s3404_s3  ;;  %v347_v20 = vld [vmem:[%s3405_s4 + $0x48] sm:$0xff]  ;;  %v346_v22 = vld [vmem:[%s3405_s4 + $0x40] sm:$0xff]  ;;  %v345_v23 = vld [vmem:[%s3405_s4 + $0x38] sm:$0xff] }
   0x4   :  { %s3448_s29 = sld [smem:[#allocation2_spill]]  ;;  %359 = vmatpush.msra.mxu1 %v352_v14  ;;  %v344_v24 = vld [vmem:[%s3405_s4 + $0x30] sm:$0xff]  ;;  %v343_v25 = vld [vmem:[%s3405_s4 + $0x28] sm:$0xff]  ;;  %v342_v27 = vld [vmem:[%s3405_s4 + $0x20] sm:$0xff] }
   0x5   :  { %s3449_s23 = sld [smem:[#allocation3_spill]]  ;;  %v341_v28 = vld [vmem:[%s3405_s4 + $0x18] sm:$0xff]  ;;  %v340_v29 = vld [vmem:[%s3405_s4 + $0x10] sm:$0xff]  ;;  %v339_v31 = vld [vmem:[%s3405_s4 + $0x8] sm:$0xff] }
   0x6   :  { %360 = vmatpush.msra.mxu1 %v351_v15  ;;  %v338_v32 = vld [vmem:[%s3405_s4] sm:$0xff]  ;;  %s3450_s2 = sld [smem:[#allocation4_spill]] }
   0x8   :  { %361 = vmatpush.msra.mxu1 %v350_v17 }
   0xa   :  { %v91_v0 = vld [vmem:[%s3448_s29 + $0x18] sm:$0xff]  ;;  %v90_v1 = vld [vmem:[%s3448_s29 + $0x10] sm:$0xff]  ;;  %v89_v2 = vld [vmem:[%s3448_s29 + $0x8] sm:$0xff]  ;;  %362 = vmatpush.msra.mxu1 %v349_v18 }
   0xb   :  { %205 = vmatpush.msra.mxu0 %v91_v0  ;;  %1678 = vmatpush.msra.mxu3 %v91_v0  ;;  %v88_v3 = vld [vmem:[%s3448_s29] sm:$0xff]  ;;  %v57_v5 = vld [vmem:[%s3449_s23 + $0x8] sm:$0xff]  ;;  %v58_v6 = vld [vmem:[%s3449_s23 + $0x10] sm:$0xff] }
   0xc   :  { %v56_v4 = vld [vmem:[%s3449_s23] sm:$0xff]  ;;  %v59_v7 = vld [vmem:[%s3449_s23 + $0x18] sm:$0xff]  ;;  %v61_v9 = vld [vmem:[%s3449_s23 + $0x28] sm:$0xff]  ;;  %363 = vmatpush.msra.mxu1 %v348_v19 }
   0xd   :  { %206 = vmatpush.msra.mxu0 %v90_v1  ;;  %1679 = vmatpush.msra.mxu3 %v90_v1  ;;  %v60_v8 = vld [vmem:[%s3449_s23 + $0x20] sm:$0xff]  ;;  %v62_v10 = vld [vmem:[%s3449_s23 + $0x30] sm:$0xff]  ;;  %v63_v11 = vld [vmem:[%s3449_s23 + $0x38] sm:$0xff] }
   0xe   :  { %v64_v12 = vld [vmem:[%s3449_s23 + $0x40] sm:$0xff]  ;;  %v65_v16 = vld [vmem:[%s3449_s23 + $0x48] sm:$0xff]  ;;  %v66_v21 = vld [vmem:[%s3449_s23 + $0x50] sm:$0xff]  ;;  %364 = vmatpush.msra.mxu1 %v347_v20 }
   0xf   :  { %207 = vmatpush.msra.mxu0 %v89_v2  ;;  %1680 = vmatpush.msra.mxu3 %v89_v2  ;;  %v67_v26 = vld [vmem:[%s3449_s23 + $0x58] sm:$0xff]  ;;  %v68_v30 = vld [vmem:[%s3449_s23 + $0x60] sm:$0xff]  ;;  %v69_v33 = vld [vmem:[%s3449_s23 + $0x68] sm:$0xff] }
  0x10   :  { %365 = vmatpush.msra.mxu1 %v346_v22  ;;  %v70_v34 = vld [vmem:[%s3449_s23 + $0x70] sm:$0xff]  ;;  %v71_v35 = vld [vmem:[%s3449_s23 + $0x78] sm:$0xff]  ;;  %v2023_v36 = vld [vmem:[%s3450_s2] ss:$0 sm:$0xff] }
  0x11   :  { %208 = vmatpush.msra.mxu0 %v88_v3  ;;  %1681 = vmatpush.msra.mxu3 %v88_v3  ;;  %v72_v38 = vld [vmem:[%s3449_s23 + $0x80] sm:$0xff]  ;;  %v73_v42 = vld [vmem:[%s3449_s23 + $0x88] sm:$0xff]  ;;  %v74_v46 = vld [vmem:[%s3449_s23 + $0x90] sm:$0xff] }
  0x12   :  { %1614 = vmatmul.msk.f32.vlgmr.msra.gmra.mxu0 %vm96_vm0, %v56_v4  ;;  %366 = vmatpush.msra.mxu1 %v345_v23  ;;  %v75_v50 = vld [vmem:[%s3449_s23 + $0x98] sm:$0xff]  ;;  %v76_v54 = vld [vmem:[%s3449_s23 + $0xa0] sm:$0xff]  ;;  %v77_v58 = vld [vmem:[%s3449_s23 + $0xa8] sm:$0xff] }
  0x13   :  { %1682 = vmatpush.msrb.mxu3 %v353_v13  ;;  %v82_v61 = vld [vmem:[%s3449_s23 + $0xd0] sm:$0xff]  ;;  %v83_v1 = vld [vmem:[%s3449_s23 + $0xd8] sm:$0xff] }
  0x14   :  { %367 = vmatpush.msra.mxu1 %v344_v24  ;;  %1640 = vmatmul.msk.f32.vlgmr.msra.gmra.mxu3 %vm96_vm0, %v82_v61  ;;  %v78_v63 = vld [vmem:[%s3449_s23 + $0xb0] sm:$0xff]  ;;  %v79_v4 = vld [vmem:[%s3449_s23 + $0xb8] sm:$0xff] }
  0x15   :  { %1683 = vmatpush.msrb.mxu3 %v352_v14  ;;  %v518_v13 = vld [vmem:[%s3407_s6 + $0x78] sm:$0xff] }
  0x16   :  { %368 = vmatpush.msra.mxu1 %v343_v25  ;;  %523 = vmatpush.msra.mxu2 %v518_v13 }
  0x17   :  { %1684 = vmatpush.msrb.mxu3 %v351_v15  ;;  %v81_v15 = vld [vmem:[%s3449_s23 + $0xc8] sm:$0xff] }
  0x18   :  { %369 = vmatpush.msra.mxu1 %v342_v27 }
  0x19   :  { %1685 = vmatpush.msrb.mxu3 %v350_v17  ;;  %v517_v17 = vld [vmem:[%s3407_s6 + $0x70] sm:$0xff] }
  0x1a   :  { %1615 = vmatmul.msk.f32.gmra.mxu0 %vm96_vm0, %v57_v5  ;;  %370 = vmatpush.msra.mxu1 %v341_v28 }
  0x1b   :  { %1686 = vmatpush.msrb.mxu3 %v349_v18  ;;  %v516_v18 = vld [vmem:[%s3407_s6 + $0x68] sm:$0xff]  ;;  %524 = vmatpush.msra.mxu2 %v517_v17 }
  0x1c   :  { %371 = vmatpush.msra.mxu1 %v340_v29  ;;  %1641 = vmatmul.msk.f32.gmra.mxu3 %vm96_vm0, %v83_v1 }
  0x1d   :  { %1687 = vmatpush.msrb.mxu3 %v348_v19  ;;  %v86_v19 = vld [vmem:[%s3449_s23 + $0xf0] sm:$0xff]  ;;  %525 = vmatpush.msra.mxu2 %v516_v18 }
  0x1e   :  { %372 = vmatpush.msra.mxu1 %v339_v31 }
  0x1f   :  { %1688 = vmatpush.msrb.mxu3 %v347_v20 }
  0x20   :  { %373 = vmatpush.msra.mxu1 %v338_v32 }
  0x21   :  { %1689 = vmatpush.msrb.mxu3 %v346_v22  ;;  %v514_v22 = vld [vmem:[%s3407_s6 + $0x58] sm:$0xff] }
  0x22   :  { %1616 = vmatmul.msk.f32.gmra.mxu0 %vm96_vm0, %v58_v6  ;;  %v84_v6 = vld [vmem:[%s3449_s23 + $0xe0] sm:$0xff] }
  0x23   :  { %1690 = vmatpush.msrb.mxu3 %v345_v23 }
  0x24   :  { %1642 = vmatmul.msk.f32.gmra.mxu3 %vm96_vm0, %v84_v6 }
  0x25   :  { %1691 = vmatpush.msrb.mxu3 %v344_v24 }
  0x27   :  { %1692 = vmatpush.msrb.mxu3 %v343_v25  ;;  %v513_v25 = vld [vmem:[%s3407_s6 + $0x50] sm:$0xff] }
  0x29   :  { %1693 = vmatpush.msrb.mxu3 %v342_v27  ;;  %v87_v27 = vld [vmem:[%s3449_s23 + $0xf8] sm:$0xff] }
  0x2a   :  { %1617 = vmatmul.msk.f32.gmra.mxu0 %vm96_vm0, %v59_v7 }
  0x2b   :  { %1694 = vmatpush.msrb.mxu3 %v341_v28 }
  0x2d   :  { %1695 = vmatpush.msrb.mxu3 %v340_v29  ;;  %v511_v29 = vld [vmem:[%s3407_s6 + $0x40] sm:$0xff] }
  0x2f   :  { %1696 = vmatpush.msrb.mxu3 %v339_v31 }
  0x31   :  { %1697 = vmatpush.msrb.mxu3 %v338_v32 }
  0x32   :  { %1618 = vmatmul.msk.f32.gmra.mxu0 %vm96_vm0, %v60_v8 }
  0x33   :  { %1698 = vmatpush.msra.mxu3 %v518_v13 }
  0x35   :  { %1699 = vmatpush.msra.mxu3 %v517_v17 }
  0x37   :  { %1700 = vmatpush.msra.mxu3 %v516_v18 }
  0x3a   :  { %1619 = vmatmul.msk.f32.gmra.mxu0 %vm96_vm0, %v61_v9  ;;  %v80_v9 = vld [vmem:[%s3449_s23 + $0xc0] sm:$0xff] }
  0x42   :  { %1620 = vmatmul.msk.f32.gmra.mxu0 %vm96_vm0, %v62_v10 }
  0x4a   :  { %1621 = vmatmul.msk.f32.gmra.mxu0 %vm96_vm0, %v63_v11  ;;  %v85_v11 = vld [vmem:[%s3449_s23 + $0xe8] sm:$0xff] }
  0x4b   :  { %1643 = vmatmul.msk.f32.gmra.mxu3 %vm96_vm0, %v85_v11 }
  0x52   :  { %1622 = vmatmul.msk.f32.gmra.mxu0 %vm96_vm0, %v64_v12 }
  0x53   :  { %1644 = vmatmul.msk.f32.gmra.mxu3 %vm96_vm0, %v86_v19 }
  0x5a   :  { %1623 = vmatmul.msk.f32.gmra.mxu0 %vm96_vm0, %v65_v16 }
  0x5b   :  { %1645 = vmatmul.msk.f32.gmra.mxu3 %vm96_vm0, %v87_v27 }
  0x62   :  { %1624 = vmatmul.msk.f32.gmra.mxu0 %vm96_vm0, %v66_v21  ;;  %v515_v21 = vld [vmem:[%s3407_s6 + $0x60] sm:$0xff] }
  0x63   :  { %526 = vmatpush.msra.mxu2 %v515_v21  ;;  %1701 = vmatpush.msra.mxu3 %v515_v21 }
  0x65   :  { %527 = vmatpush.msra.mxu2 %v514_v22  ;;  %1702 = vmatpush.msra.mxu3 %v514_v22 }
  0x67   :  { %528 = vmatpush.msra.mxu2 %v513_v25  ;;  %1703 = vmatpush.msra.mxu3 %v513_v25 }
  0x6a   :  { %1625 = vmatmul.msk.f32.gmra.mxu0 %vm96_vm0, %v67_v26  ;;  %v512_v26 = vld [vmem:[%s3407_s6 + $0x48] sm:$0xff] }
  0x6b   :  { %529 = vmatpush.msra.mxu2 %v512_v26  ;;  %1704 = vmatpush.msra.mxu3 %v512_v26 }
  0x6d   :  { %530 = vmatpush.msra.mxu2 %v511_v29  ;;  %1705 = vmatpush.msra.mxu3 %v511_v29 }
  0x72   :  { %1626 = vmatmul.msk.f32.gmra.mxu0 %vm96_vm0, %v68_v30  ;;  %v510_v30 = vld [vmem:[%s3407_s6 + $0x38] sm:$0xff] }
  0x73   :  { %531 = vmatpush.msra.mxu2 %v510_v30  ;;  %1706 = vmatpush.msra.mxu3 %v510_v30 }
  0x7a   :  { %1627 = vmatmul.msk.f32.gmra.mxu0 %vm96_vm0, %v69_v33  ;;  %v509_v33 = vld [vmem:[%s3407_s6 + $0x30] sm:$0xff] }
  0x7b   :  { %532 = vmatpush.msra.mxu2 %v509_v33  ;;  %1707 = vmatpush.msra.mxu3 %v509_v33 }
  0x82   :  { %1628 = vmatmul.msk.f32.gmra.mxu0 %vm96_vm0, %v70_v34  ;;  %v508_v34 = vld [vmem:[%s3407_s6 + $0x28] sm:$0xff] }
  0x83   :  { %533 = vmatpush.msra.mxu2 %v508_v34  ;;  %1708 = vmatpush.msra.mxu3 %v508_v34 }
  0x8a   :  { %1629 = vmatmul.msk.f32.gmra.mxu0 %vm96_vm0, %v71_v35 }
  0x8f   :  { %v210_v37 = vpop.f32.mrf.mxu0 }
  0x90   :  { %v211_v39 = vadd.f32 %v2023_v36, %v210_v37  ;;  %v507_v37 = vld [vmem:[%s3407_s6 + $0x20] sm:$0xff] }
  0x91   :  { %534 = vmatpush.msra.mxu2 %v507_v37  ;;  %1709 = vmatpush.msra.mxu3 %v507_v37 }
  0x92   :  { %1630 = vmatmul.msk.f32.gmra.mxu0 %vm96_vm0, %v72_v38  ;;  %v306_v40 = vmax.f32 %v211_v39, 0.0  ;;  %v506_v38 = vld [vmem:[%s3407_s6 + $0x18] sm:$0xff] }
  0x93   :  { %535 = vmatpush.msra.mxu2 %v506_v38  ;;  %1710 = vmatpush.msra.mxu3 %v506_v38 }
  0x94   :  { %374 = vmatmul.f32.vlgmr.msra.gmra.mxu1 %v306_v40 }
  0x97   :  { %v213_v41 = vpop.f32.mrf.mxu0 }
  0x98   :  { %v214_v43 = vadd.f32 %v2023_v36, %v213_v41  ;;  %v505_v41 = vld [vmem:[%s3407_s6 + $0x10] sm:$0xff] }
  0x99   :  { %536 = vmatpush.msra.mxu2 %v505_v41  ;;  %1711 = vmatpush.msra.mxu3 %v505_v41  ;;  %v288_v41 = vpop.f32.mrf.mxu3 }
  0x9a   :  { %1631 = vmatmul.msk.f32.gmra.mxu0 %vm96_vm0, %v73_v42  ;;  %v307_v44 = vmax.f32 %v214_v43, 0.0  ;;  %v504_v43 = vld [vmem:[%s3407_s6 + $0x8] sm:$0xff] }
  0x9b   :  { %537 = vmatpush.msra.mxu2 %v504_v43  ;;  %1712 = vmatpush.msra.mxu3 %v504_v43 }
  0x9c   :  { %377 = vmatmul.f32.gmra.mxu1 %v307_v44  ;;  %v503_v44 = vld [vmem:[%s3407_s6] sm:$0xff] }
  0x9d   :  { %538 = vmatpush.msra.mxu2 %v503_v44  ;;  %1713 = vmatpush.msra.mxu3 %v503_v44 }
  0x9f   :  { %v216_v45 = vpop.f32.mrf.mxu0 }
  0xa0   :  { %v217_v47 = vadd.f32 %v2023_v36, %v216_v45 }
  0xa2   :  { %1632 = vmatmul.msk.f32.gmra.mxu0 %vm96_vm0, %v74_v46  ;;  %v308_v48 = vmax.f32 %v217_v47, 0.0 }
  0xa4   :  { %380 = vmatmul.f32.gmra.mxu1 %v308_v48 }
  0xa7   :  { %v219_v49 = vpop.f32.mrf.mxu0 }
  0xa8   :  { %v220_v51 = vadd.f32 %v2023_v36, %v219_v49 }
  0xaa   :  { %1633 = vmatmul.msk.f32.gmra.mxu0 %vm96_vm0, %v75_v50  ;;  %v309_v52 = vmax.f32 %v220_v51, 0.0 }
  0xac   :  { %383 = vmatmul.f32.gmra.mxu1 %v309_v52 }
  0xaf   :  { %v222_v53 = vpop.f32.mrf.mxu0 }
  0xb0   :  { %v223_v55 = vadd.f32 %v2023_v36, %v222_v53 }
  0xb2   :  { %1634 = vmatmul.msk.f32.gmra.mxu0 %vm96_vm0, %v76_v54  ;;  %v310_v56 = vmax.f32 %v223_v55, 0.0  ;;  %v2156_v54 = vld [vmem:[%s3406_s5] ss:$0 sm:$0xff] }
  0xb4   :  { %386 = vmatmul.f32.gmra.mxu1 %v310_v56 }
  0xb7   :  { %v225_v57 = vpop.f32.mrf.mxu0 }
  0xb8   :  { %v226_v59 = vadd.f32 %v2023_v36, %v225_v57 }
  0xba   :  { %1635 = vmatmul.msk.f32.gmra.mxu0 %vm96_vm0, %v77_v58  ;;  %v311_v60 = vmax.f32 %v226_v59, 0.0 }
  0xbc   :  { %389 = vmatmul.f32.gmra.mxu1 %v311_v60 }
  0xbf   :  { %v228_v62 = vpop.f32.mrf.mxu0 }
  0xc0   :  { %v229_v0 = vadd.f32 %v2023_v36, %v228_v62 }
  0xc2   :  { %1636 = vmatmul.msk.f32.gmra.mxu0 %vm96_vm0, %v78_v63  ;;  %v312_v2 = vmax.f32 %v229_v0, 0.0 }
  0xc4   :  { %392 = vmatmul.f32.gmra.mxu1 %v312_v2 }
  0xc7   :  { %v231_v3 = vpop.f32.mrf.mxu0 }
  0xc8   :  { %v232_v5 = vadd.f32 %v2023_v36, %v231_v3 }
  0xca   :  { %1637 = vmatmul.msk.f32.gmra.mxu0 %vm96_vm0, %v79_v4  ;;  %v313_v7 = vmax.f32 %v232_v5, 0.0 }
  0xcc   :  { %395 = vmatmul.f32.gmra.mxu1 %v313_v7 }
  0xcf   :  { %v234_v8 = vpop.f32.mrf.mxu0 }
  0xd0   :  { %v235_v10 = vadd.f32 %v2023_v36, %v234_v8 }
  0xd2   :  { %1638 = vmatmul.msk.f32.gmra.mxu0 %vm96_vm0, %v80_v9  ;;  %v314_v12 = vmax.f32 %v235_v10, 0.0 }
  0xd4   :  { %398 = vmatmul.f32.gmra.mxu1 %v314_v12 }
  0xd7   :  { %v237_v14 = vpop.f32.mrf.mxu0 }
  0xd8   :  { %v238_v16 = vadd.f32 %v2023_v36, %v237_v14 }
  0xda   :  { %1639 = vmatmul.msk.f32.gmra.mxu0 %vm96_vm0, %v81_v15  ;;  %v315_v20 = vmax.f32 %v238_v16, 0.0 }
  0xdc   :  { %401 = vmatmul.f32.gmra.mxu1 %v315_v20 }
  0xdf   :  { %v240_v23 = vpop.f32.mrf.mxu0 }
  0xe0   :  { %v241_v24 = vadd.f32 %v2023_v36, %v240_v23 }
  0xe2   :  { %v316_v28 = vmax.f32 %v241_v24, 0.0 }
  0xe4   :  { %404 = vmatmul.f32.gmra.mxu1 %v316_v28 }
  0xe7   :  { %v243_v31 = vpop.f32.mrf.mxu0 }
  0xe8   :  { %v244_v32 = vadd.f32 %v2023_v36, %v243_v31 }
  0xea   :  { %v317_v35 = vmax.f32 %v244_v32, 0.0 }
  0xec   :  { %407 = vmatmul.f32.gmra.mxu1 %v317_v35 }
  0xef   :  { %v246_v39 = vpop.f32.mrf.mxu0 }
  0xf0   :  { %v247_v40 = vadd.f32 %v2023_v36, %v246_v39 }
  0xf2   :  { %v318_v42 = vmax.f32 %v247_v40, 0.0 }
  0xf4   :  { %410 = vmatmul.f32.gmra.mxu1 %v318_v42 }
  0xf7   :  { %v249_v45 = vpop.f32.mrf.mxu0 }
  0xf8   :  { %v250_v46 = vadd.f32 %v2023_v36, %v249_v45 }
  0xfa   :  { %v319_v47 = vmax.f32 %v250_v46, 0.0 }
  0xfc   :  { %413 = vmatmul.f32.gmra.mxu1 %v319_v47 }
  0xff   :  { %v252_v48 = vpop.f32.mrf.mxu0 }
 0x100   :  { %v253_v49 = vadd.f32 %v2023_v36, %v252_v48 }
 0x102   :  { %v320_v50 = vmax.f32 %v253_v49, 0.0 }
 0x104   :  { %416 = vmatmul.f32.gmra.mxu1 %v320_v50  ;;  %v291_v50 = vpop.f32.mrf.mxu3 }
 0x107   :  { %v255_v51 = vpop.f32.mrf.mxu0 }
 0x108   :  { %v256_v52 = vadd.f32 %v2023_v36, %v255_v51 }
 0x10a   :  { %v321_v53 = vmax.f32 %v256_v52, 0.0 }
 0x10c   :  { %419 = vmatmul.f32.gmra.mxu1 %v321_v53 }
 0x10f   :  { %v258_v55 = vpop.f32.mrf.mxu0 }
 0x110   :  { %v259_v56 = vadd.f32 %v2023_v36, %v258_v55  ;;  %v289_v55 = vadd.f32 %v2023_v36, %v288_v41 }
 0x111   :  { %v375_v57 = vpop.f32.mrf.mxu1 }
 0x112   :  { %v2160_v58 = vadd.f32 %v2156_v54, %v375_v57  ;;  %v322_v59 = vmax.f32 %v259_v56, 0.0  ;;  %v332_v56 = vmax.f32 %v289_v55, 0.0 }
 0x114   :  { %422 = vmatmul.f32.gmra.mxu1 %v322_v59  ;;  %v471_v60 = vmax.f32 %v2160_v58, 0.0 }
 0x116   :  { %539 = vmatmul.f32.vlgmr.msra.gmra.mxu2 %v471_v60 }
 0x117   :  { %v261_v61 = vpop.f32.mrf.mxu0 }
 0x118   :  { %v262_v62 = vadd.f32 %v2023_v36, %v261_v61  ;;  %v294_v61 = vpop.f32.mrf.mxu3 }
 0x119   :  { %v378_v63 = vpop.f32.mrf.mxu1 }
 0x11a   :  { %v2167_v0 = vadd.f32 %v2156_v54, %v378_v63  ;;  %v323_v1 = vmax.f32 %v262_v62, 0.0  ;;  %v292_v63 = vadd.f32 %v2023_v36, %v291_v50 }
 0x11c   :  { %425 = vmatmul.f32.gmra.mxu1 %v323_v1  ;;  %v472_v2 = vmax.f32 %v2167_v0, 0.0  ;;  %v333_v1 = vmax.f32 %v292_v63, 0.0 }
 0x11e   :  { %542 = vmatmul.f32.gmra.mxu2 %v472_v2 }
 0x11f   :  { %v264_v3 = vpop.f32.mrf.mxu0 }
 0x120   :  { %v265_v4 = vadd.f32 %v2023_v36, %v264_v3 }
 0x121   :  { %v381_v5 = vpop.f32.mrf.mxu1 }
 0x122   :  { %v2174_v6 = vadd.f32 %v2156_v54, %v381_v5  ;;  %v324_v7 = vmax.f32 %v265_v4, 0.0 }
 0x124   :  { %428 = vmatmul.f32.gmra.mxu1 %v324_v7  ;;  %v473_v8 = vmax.f32 %v2174_v6, 0.0  ;;  %v295_v7 = vadd.f32 %v2023_v36, %v294_v61 }
 0x126   :  { %545 = vmatmul.f32.gmra.mxu2 %v473_v8 }
 0x127   :  { %v267_v9 = vpop.f32.mrf.mxu0 }
 0x128   :  { %v268_v10 = vadd.f32 %v2023_v36, %v267_v9  ;;  %v297_v9 = vpop.f32.mrf.mxu3 }
 0x129   :  { %v384_v11 = vpop.f32.mrf.mxu1 }
 0x12a   :  { %v2181_v12 = vadd.f32 %v2156_v54, %v384_v11  ;;  %v325_v13 = vmax.f32 %v268_v10, 0.0  ;;  %v334_v10 = vmax.f32 %v295_v7, 0.0 }
 0x12c   :  { %431 = vmatmul.f32.gmra.mxu1 %v325_v13  ;;  %v474_v14 = vmax.f32 %v2181_v12, 0.0 }
 0x12e   :  { %548 = vmatmul.f32.gmra.mxu2 %v474_v14 }
 0x12f   :  { %v270_v15 = vpop.f32.mrf.mxu0 }
 0x130   :  { %v271_v16 = vadd.f32 %v2023_v36, %v270_v15 }
 0x131   :  { %v387_v17 = vpop.f32.mrf.mxu1 }
 0x132   :  { %v2188_v18 = vadd.f32 %v2156_v54, %v387_v17  ;;  %v326_v19 = vmax.f32 %v271_v16, 0.0  ;;  %v298_v16 = vadd.f32 %v2023_v36, %v297_v9  ;;  %v300_v17 = vpop.f32.mrf.mxu3 }
 0x134   :  { %434 = vmatmul.f32.gmra.mxu1 %v326_v19  ;;  %v475_v20 = vmax.f32 %v2188_v18, 0.0  ;;  %v335_v19 = vmax.f32 %v298_v16, 0.0 }
 0x136   :  { %551 = vmatmul.f32.gmra.mxu2 %v475_v20 }
 0x137   :  { %v273_v21 = vpop.f32.mrf.mxu0 }
 0x138   :  { %v274_v22 = vadd.f32 %v2023_v36, %v273_v21 }
 0x139   :  { %v390_v23 = vpop.f32.mrf.mxu1 }
 0x13a   :  { %v2195_v24 = vadd.f32 %v2156_v54, %v390_v23  ;;  %v327_v25 = vmax.f32 %v274_v22, 0.0 }
 0x13c   :  { %437 = vmatmul.f32.gmra.mxu1 %v327_v25  ;;  %v476_v26 = vmax.f32 %v2195_v24, 0.0  ;;  %v301_v25 = vadd.f32 %v2023_v36, %v300_v17  ;;  %v1223_v24 = vld [vmem:[%s3413_s12 + $0x78] sm:$0xff] }
 0x13d   :  { %1228 = vmatpush.msrb.mxu1 %v1223_v24 }
 0x13e   :  { %554 = vmatmul.f32.gmra.mxu2 %v476_v26 }
 0x13f   :  { %v276_v27 = vpop.f32.mrf.mxu0 }
 0x140   :  { %v277_v28 = vadd.f32 %v2023_v36, %v276_v27  ;;  %v336_v27 = vmax.f32 %v301_v25, 0.0 }
 0x141   :  { %v393_v29 = vpop.f32.mrf.mxu1 }
 0x142   :  { %v2202_v30 = vadd.f32 %v2156_v54, %v393_v29  ;;  %v328_v31 = vmax.f32 %v277_v28, 0.0  ;;  %v303_v29 = vpop.f32.mrf.mxu3 }
 0x144   :  { %440 = vmatmul.f32.gmra.mxu1 %v328_v31  ;;  %v477_v32 = vmax.f32 %v2202_v30, 0.0 }
 0x146   :  { %557 = vmatmul.f32.gmra.mxu2 %v477_v32 }
 0x147   :  { %v279_v33 = vpop.f32.mrf.mxu0 }
 0x148   :  { %v280_v34 = vadd.f32 %v2023_v36, %v279_v33 }
 0x149   :  { %v396_v35 = vpop.f32.mrf.mxu1 }
 0x14a   :  { %v2209_v37 = vadd.f32 %v2156_v54, %v396_v35  ;;  %v329_v38 = vmax.f32 %v280_v34, 0.0  ;;  %v304_v34 = vadd.f32 %v2023_v36, %v303_v29 }
 0x14c   :  { %443 = vmatmul.f32.gmra.mxu1 %v329_v38  ;;  %v478_v39 = vmax.f32 %v2209_v37, 0.0  ;;  %v337_v35 = vmax.f32 %v304_v34, 0.0  ;;  %v1222_v37 = vld [vmem:[%s3413_s12 + $0x70] sm:$0xff] }
 0x14d   :  { %1229 = vmatpush.msrb.mxu1 %v1222_v37 }
 0x14e   :  { %560 = vmatmul.f32.gmra.mxu2 %v478_v39 }
 0x14f   :  { %v282_v40 = vpop.f32.mrf.mxu0 }
 0x150   :  { %v283_v42 = vadd.f32 %v2023_v36, %v282_v40 }
 0x151   :  { %v399_v43 = vpop.f32.mrf.mxu1 }
 0x152   :  { %v330_v44 = vmax.f32 %v283_v42, 0.0  ;;  %v2216_v45 = vadd.f32 %v2156_v54, %v399_v43 }
 0x154   :  { %446 = vmatmul.f32.vlgmr.msrb.gmra.mxu3 %v330_v44  ;;  %v479_v46 = vmax.f32 %v2216_v45, 0.0  ;;  %v2279_v44 = vld [vmem:[%s3408_s7] ss:$0 sm:$0xff] }
 0x156   :  { %563 = vmatmul.f32.gmra.mxu2 %v479_v46 }
 0x157   :  { %v285_v47 = vpop.f32.mrf.mxu0 }
 0x158   :  { %v286_v48 = vadd.f32 %v2023_v36, %v285_v47 }
 0x159   :  { %v402_v49 = vpop.f32.mrf.mxu1 }
 0x15a   :  { %v2223_v51 = vadd.f32 %v2156_v54, %v402_v49  ;;  %v331_v52 = vmax.f32 %v286_v48, 0.0 }
 0x15c   :  { %449 = vmatmul.f32.gmra.mxu3 %v331_v52  ;;  %v3444_v53 = vmax.f32 %v2223_v51, 0.0 }
 0x15e   :  { %566 = vmatmul.f32.gmra.mxu2 %v3444_v53 }
 0x161   :  { %v405_v57 = vpop.f32.mrf.mxu1 }
 0x162   :  { %v2230_v59 = vadd.f32 %v2156_v54, %v405_v57 }
 0x164   :  { %452 = vmatmul.f32.gmra.mxu3 %v332_v56  ;;  %v3442_v62 = vmax.f32 %v2230_v59, 0.0 }
 0x166   :  { %569 = vmatmul.f32.gmra.mxu2 %v3442_v62 }
 0x169   :  { %v408_v3 = vpop.f32.mrf.mxu1 }
 0x16a   :  { %v2237_v4 = vadd.f32 %v2156_v54, %v408_v3 }
 0x16c   :  { %455 = vmatmul.f32.gmra.mxu3 %v333_v1  ;;  %v3441_v5 = vmax.f32 %v2237_v4, 0.0 }
 0x16e   :  { %572 = vmatmul.f32.gmra.mxu2 %v3441_v5 }
 0x171   :  { %v411_v11 = vpop.f32.mrf.mxu1 }
 0x172   :  { %v2244_v13 = vadd.f32 %v2156_v54, %v411_v11 }
 0x174   :  { %458 = vmatmul.f32.gmra.mxu3 %v334_v10  ;;  %v3439_v15 = vmax.f32 %v2244_v13, 0.0 }
 0x176   :  { %575 = vmatmul.f32.gmra.mxu2 %v3439_v15 }
 0x179   :  { %v414_v21 = vpop.f32.mrf.mxu1 }
 0x17a   :  { %v2251_v22 = vadd.f32 %v2156_v54, %v414_v21 }
 0x17c   :  { %461 = vmatmul.f32.gmra.mxu3 %v335_v19  ;;  %v3438_v23 = vmax.f32 %v2251_v22, 0.0 }
 0x17e   :  { %578 = vmatmul.f32.gmra.mxu2 %v3438_v23 }
 0x181   :  { %v417_v28 = vpop.f32.mrf.mxu1 }
 0x182   :  { %v2258_v31 = vadd.f32 %v2156_v54, %v417_v28 }
 0x184   :  { %464 = vmatmul.f32.gmra.mxu3 %v336_v27  ;;  %v3436_v33 = vmax.f32 %v2258_v31, 0.0 }
 0x186   :  { %581 = vmatmul.f32.gmra.mxu2 %v3436_v33 }
 0x189   :  { %v420_v38 = vpop.f32.mrf.mxu1 }
 0x18a   :  { %v2265_v40 = vadd.f32 %v2156_v54, %v420_v38  ;;  %v650_v38 = vld [vmem:[%s3410_s8 + $0x70] sm:$0xff] }
 0x18c   :  { %467 = vmatmul.f32.gmra.mxu3 %v337_v35  ;;  %v3434_v41 = vmax.f32 %v2265_v40, 0.0  ;;  %v651_v35 = vld [vmem:[%s3410_s8 + $0x78] sm:$0xff] }
 0x18d   :  { %656 = vmatpush.msrb.mxu3 %v651_v35 }
 0x18e   :  { %584 = vmatmul.f32.gmra.mxu2 %v3434_v41 }
 0x18f   :  { %657 = vmatpush.msrb.mxu3 %v650_v38 }
 0x191   :  { %v423_v42 = vpop.f32.mrf.mxu1 }
 0x192   :  { %v2271_v43 = vadd.f32 %v2156_v54, %v423_v42 }
 0x194   :  { %v3433_v36 = vmax.f32 %v2271_v43, 0.0 }
 0x196   :  { %587 = vmatmul.f32.gmra.mxu2 %v3433_v36 }
 0x199   :  { %v426_v47 = vpop.f32.mrf.mxu1  ;;  %v540_v48 = vpop.f32.mrf.mxu2 }
 0x19a   :  { %v2282_v49 = vadd.f32 %v2156_v54, %v426_v47  ;;  %v2285_v50 = vadd.f32 %v2279_v44, %v540_v48 }
 0x19c   :  { %1506 = vst.msk [vmem:[%s3409_s16] sm:$0xff] %vm966_vm1, %v2285_v50  ;;  %v3431_v52 = vmax.f32 %v2282_v49, 0.0 }
 0x19e   :  { %590 = vmatmul.f32.gmra.mxu2 %v3431_v52 }
 0x1a1   :  { %v429_v55 = vpop.f32.mrf.mxu1  ;;  %v543_v56 = vpop.f32.mrf.mxu2 }
 0x1a2   :  { %v2296_v57 = vadd.f32 %v2156_v54, %v429_v55  ;;  %v2299_v61 = vadd.f32 %v2279_v44, %v543_v56 }
 0x1a4   :  { %1507 = vst.msk [vmem:[%s3409_s16 + $0x8] sm:$0xff] %vm966_vm1, %v2299_v61  ;;  %v3430_v63 = vmax.f32 %v2296_v57, 0.0 }
 0x1a6   :  { %593 = vmatmul.f32.gmra.mxu2 %v3430_v63 }
 0x1a9   :  { %v432_v1 = vpop.f32.mrf.mxu1  ;;  %v546_v3 = vpop.f32.mrf.mxu2 }
 0x1aa   :  { %v2310_v7 = vadd.f32 %v2156_v54, %v432_v1  ;;  %v2313_v9 = vadd.f32 %v2279_v44, %v546_v3  ;;  %v961_v1 = vld [vmem:[%s3411_s10] sm:$0xff]  ;;  %v649_v3 = vld [vmem:[%s3410_s8 + $0x68] sm:$0xff] }
 0x1ab   :  { %1078 = vmatpush.msrb.mxu0 %v961_v1  ;;  %658 = vmatpush.msrb.mxu3 %v649_v3 }
 0x1ac   :  { %1508 = vst.msk [vmem:[%s3409_s16 + $0x10] sm:$0xff] %vm966_vm1, %v2313_v9  ;;  %v3428_v10 = vmax.f32 %v2310_v7, 0.0 }
 0x1ae   :  { %596 = vmatmul.f32.gmra.mxu2 %v3428_v10 }
 0x1b1   :  { %v435_v11 = vpop.f32.mrf.mxu1  ;;  %v549_v16 = vpop.f32.mrf.mxu2 }
 0x1b2   :  { %v2324_v17 = vadd.f32 %v2156_v54, %v435_v11  ;;  %v2327_v19 = vadd.f32 %v2279_v44, %v549_v16  ;;  %v648_v11 = vld [vmem:[%s3410_s8 + $0x60] sm:$0xff] }
 0x1b3   :  { %659 = vmatpush.msrb.mxu3 %v648_v11  ;;  %v645_v11 = vld [vmem:[%s3410_s8 + $0x48] sm:$0xff] }
 0x1b4   :  { %1509 = vst.msk [vmem:[%s3409_s16 + $0x18] sm:$0xff] %vm966_vm1, %v2327_v19  ;;  %v3427_v21 = vmax.f32 %v2324_v17, 0.0 }
 0x1b6   :  { %599 = vmatmul.f32.gmra.mxu2 %v3427_v21 }
 0x1b9   :  { %v438_v25 = vpop.f32.mrf.mxu1  ;;  %v552_v27 = vpop.f32.mrf.mxu2 }
 0x1ba   :  { %v2338_v28 = vadd.f32 %v2156_v54, %v438_v25  ;;  %v2341_v29 = vadd.f32 %v2279_v44, %v552_v27 }
 0x1bc   :  { %1510 = vst.msk [vmem:[%s3409_s16 + $0x20] sm:$0xff] %vm966_vm1, %v2341_v29  ;;  %v3425_v34 = vmax.f32 %v2338_v28, 0.0 }
 0x1be   :  { %602 = vmatmul.f32.gmra.mxu2 %v3425_v34 }
 0x1c1   :  { %v441_v42 = vpop.f32.mrf.mxu1  ;;  %v555_v47 = vpop.f32.mrf.mxu2 }
 0x1c2   :  { %v2358_v48 = vadd.f32 %v2156_v54, %v441_v42  ;;  %v2361_v55 = vadd.f32 %v2279_v44, %v555_v47  ;;  %v647_v42 = vld [vmem:[%s3410_s8 + $0x58] sm:$0xff]  ;;  %v646_v47 = vld [vmem:[%s3410_s8 + $0x50] sm:$0xff] }
 0x1c3   :  { %660 = vmatpush.msrb.mxu3 %v647_v42  ;;  %v644_v42 = vld [vmem:[%s3410_s8 + $0x40] sm:$0xff] }
 0x1c4   :  { %1511 = vst.msk [vmem:[%s3409_s16 + $0x28] sm:$0xff] %vm966_vm1, %v2361_v55  ;;  %v3424_v56 = vmax.f32 %v2358_v48, 0.0 }
 0x1c5   :  { %661 = vmatpush.msrb.mxu3 %v646_v47 }
 0x1c6   :  { %605 = vmatmul.f32.gmra.mxu2 %v3424_v56 }
 0x1c7   :  { %662 = vmatpush.msrb.mxu3 %v645_v11  ;;  %v643_v11 = vld [vmem:[%s3410_s8 + $0x38] sm:$0xff] }
 0x1c9   :  { %v444_v16 = vpop.f32.mrf.mxu1  ;;  %v558_v25 = vpop.f32.mrf.mxu2  ;;  %663 = vmatpush.msrb.mxu3 %v644_v42 }
 0x1ca   :  { %v2381_v27 = vadd.f32 %v2156_v54, %v444_v16  ;;  %v2384_v35 = vadd.f32 %v2279_v44, %v558_v25 }
 0x1cb   :  { %664 = vmatpush.msrb.mxu3 %v643_v11  ;;  %v641_v11 = vld [vmem:[%s3410_s8 + $0x28] sm:$0xff] }
 0x1cc   :  { %1512 = vst.msk [vmem:[%s3409_s16 + $0x30] sm:$0xff] %vm966_vm1, %v2384_v35  ;;  %v3423_v38 = vmax.f32 %v2381_v27, 0.0 }
 0x1ce   :  { %608 = vmatmul.f32.gmra.mxu2 %v3423_v38 }
 0x1d1   :  { %v561_v1 = vpop.f32.mrf.mxu2 }
 0x1d2   :  { %v2401_v3 = vadd.f32 %v2279_v44, %v561_v1 }
 0x1d4   :  { %1513 = vst.msk [vmem:[%s3409_s16 + $0x38] sm:$0xff] %vm966_vm1, %v2401_v3 }
 0x1d7   :  { %v447_v16 = vpop.f32.mrf.mxu3 }
 0x1d8   :  { %v2412_v25 = vadd.f32 %v2156_v54, %v447_v16 }
 0x1d9   :  { %v564_v47 = vpop.f32.mrf.mxu2 }
 0x1da   :  { %v3426_v1 = vmax.f32 %v2412_v25, 0.0  ;;  %v2419_v38 = vadd.f32 %v2279_v44, %v564_v47  ;;  %v642_v47 = vld [vmem:[%s3410_s8 + $0x30] sm:$0xff] }
 0x1db   :  { %665 = vmatpush.msrb.mxu3 %v642_v47  ;;  %v640_v47 = vld [vmem:[%s3410_s8 + $0x20] sm:$0xff] }
 0x1dc   :  { %1514 = vst.msk [vmem:[%s3409_s16 + $0x40] sm:$0xff] %vm966_vm1, %v2419_v38  ;;  %611 = vmatmul.f32.vlgmr.msra.gmra.mxu3 %v3426_v1 }
 0x1dd   :  { %666 = vmatpush.msrb.mxu3 %v641_v11  ;;  %v639_v11 = vld [vmem:[%s3410_s8 + $0x18] sm:$0xff] }
 0x1df   :  { %v450_v16 = vpop.f32.mrf.mxu3  ;;  %667 = vmatpush.msrb.mxu3 %v640_v47  ;;  %v638_v47 = vld [vmem:[%s3410_s8 + $0x10] sm:$0xff] }
 0x1e0   :  { %v2432_v42 = vadd.f32 %v2156_v54, %v450_v16 }
 0x1e1   :  { %v567_v56 = vpop.f32.mrf.mxu2  ;;  %668 = vmatpush.msrb.mxu3 %v639_v11  ;;  %v637_v11 = vld [vmem:[%s3410_s8 + $0x8] sm:$0xff] }
 0x1e2   :  { %v2438_v34 = vadd.f32 %v2279_v44, %v567_v56  ;;  %v3429_v1 = vmax.f32 %v2432_v42, 0.0 }
 0x1e3   :  { %669 = vmatpush.msrb.mxu3 %v638_v47 }
 0x1e4   :  { %1515 = vst.msk [vmem:[%s3409_s16 + $0x48] sm:$0xff] %vm966_vm1, %v2438_v34  ;;  %614 = vmatmul.f32.gmra.mxu3 %v3429_v1 }
 0x1e5   :  { %670 = vmatpush.msrb.mxu3 %v637_v11 }
 0x1e7   :  { %v453_v16 = vpop.f32.mrf.mxu3 }
 0x1e8   :  { %v2452_v56 = vadd.f32 %v2156_v54, %v453_v16 }
 0x1e9   :  { %v570_v21 = vpop.f32.mrf.mxu2 }
 0x1ea   :  { %v2458_v10 = vadd.f32 %v2279_v44, %v570_v21  ;;  %v3432_v1 = vmax.f32 %v2452_v56, 0.0 }
 0x1ec   :  { %1516 = vst.msk [vmem:[%s3409_s16 + $0x50] sm:$0xff] %vm966_vm1, %v2458_v10  ;;  %617 = vmatmul.f32.gmra.mxu3 %v3432_v1 }
 0x1ef   :  { %v456_v16 = vpop.f32.mrf.mxu3 }
 0x1f0   :  { %v2472_v21 = vadd.f32 %v2156_v54, %v456_v16 }
 0x1f1   :  { %v573_v63 = vpop.f32.mrf.mxu2 }
 0x1f2   :  { %v2478_v52 = vadd.f32 %v2279_v44, %v573_v63  ;;  %v3435_v1 = vmax.f32 %v2472_v21, 0.0  ;;  %v636_v63 = vld [vmem:[%s3410_s8] sm:$0xff] }
 0x1f3   :  { %671 = vmatpush.msrb.mxu3 %v636_v63 }
 0x1f4   :  { %1517 = vst.msk [vmem:[%s3409_s16 + $0x58] sm:$0xff] %vm966_vm1, %v2478_v52  ;;  %620 = vmatmul.f32.gmra.mxu3 %v3435_v1 }
 0x1f5   :  { %1714 = vmatpush.msra.mxu3 %v1223_v24  ;;  %v3455_v24 = vmax.f32 %v2251_v22, 0.0 }
 0x1f7   :  { %v459_v16 = vpop.f32.mrf.mxu3  ;;  %1715 = vmatpush.msra.mxu3 %v1222_v37  ;;  %v1219_v37 = vld [vmem:[%s3413_s12 + $0x58] sm:$0xff] }
 0x1f8   :  { %v2495_v47 = vadd.f32 %v2156_v54, %v459_v16 }
 0x1f9   :  { %v576_v36 = vpop.f32.mrf.mxu2 }
 0x1fa   :  { %v2498_v41 = vadd.f32 %v2279_v44, %v576_v36  ;;  %v3437_v1 = vmax.f32 %v2495_v47, 0.0 }
 0x1fc   :  { %1518 = vst.msk [vmem:[%s3409_s16 + $0x60] sm:$0xff] %vm966_vm1, %v2498_v41  ;;  %623 = vmatmul.f32.gmra.mxu3 %v3437_v1 }
 0x1ff   :  { %v462_v11 = vpop.f32.mrf.mxu3 }
 0x200   :  { %v2509_v63 = vadd.f32 %v2156_v54, %v462_v11 }
 0x201   :  { %v579_v16 = vpop.f32.mrf.mxu2 }
 0x202   :  { %v2512_v33 = vadd.f32 %v2279_v44, %v579_v16  ;;  %v3440_v36 = vmax.f32 %v2509_v63, 0.0 }
 0x204   :  { %1519 = vst.msk [vmem:[%s3409_s16 + $0x68] sm:$0xff] %vm966_vm1, %v2512_v33  ;;  %626 = vmatmul.f32.gmra.mxu3 %v3440_v36 }
 0x207   :  { %v465_v1 = vpop.f32.mrf.mxu3 }
 0x208   :  { %v2523_v23 = vadd.f32 %v2156_v54, %v465_v1 }
 0x209   :  { %v582_v11 = vpop.f32.mrf.mxu2 }
 0x20a   :  { %v2526_v15 = vadd.f32 %v2279_v44, %v582_v11  ;;  %v3443_v16 = vmax.f32 %v2523_v23, 0.0 }
 0x20c   :  { %1520 = vst.msk [vmem:[%s3409_s16 + $0x70] sm:$0xff] %vm966_vm1, %v2526_v15  ;;  %629 = vmatmul.f32.gmra.mxu3 %v3443_v16 }
 0x20f   :  { %v468_v36 = vpop.f32.mrf.mxu3 }
 0x210   :  { %v2537_v5 = vadd.f32 %v2156_v54, %v468_v36 }
 0x211   :  { %v585_v1 = vpop.f32.mrf.mxu2 }
 0x212   :  { %v2540_v62 = vadd.f32 %v2279_v44, %v585_v1  ;;  %v502_v11 = vmax.f32 %v2537_v5, 0.0  ;;  %v879_v5 = vld [vmem:[%s3415_s1 + $0x70] sm:$0xff] }
 0x214   :  { %1521 = vst.msk [vmem:[%s3409_s16 + $0x78] sm:$0xff] %vm966_vm1, %v2540_v62  ;;  %632 = vmatmul.f32.gmra.mxu3 %v502_v11 }
 0x219   :  { %v588_v16 = vpop.f32.mrf.mxu2 }
 0x21a   :  { %v2551_v53 = vadd.f32 %v2279_v44, %v588_v16 }
 0x21c   :  { %1522 = vst.msk [vmem:[%s3409_s16 + $0x80] sm:$0xff] %vm966_vm1, %v2551_v53  ;;  %672 = vmatmul.f32.vlgmr.msrb.gmra.mxu3 %v471_v60 }
 0x221   :  { %v591_v54 = vpop.f32.mrf.mxu2 }
 0x222   :  { %v2561_v36 = vadd.f32 %v2279_v44, %v591_v54 }
 0x224   :  { %1523 = vst.msk [vmem:[%s3409_s16 + $0x88] sm:$0xff] %vm966_vm1, %v2561_v36  ;;  %675 = vmatmul.f32.gmra.mxu3 %v472_v2 }
 0x229   :  { %v594_v16 = vpop.f32.mrf.mxu2 }
 0x22a   :  { %v2571_v1 = vadd.f32 %v2279_v44, %v594_v16  ;;  %v1221_v16 = vld [vmem:[%s3413_s12 + $0x68] sm:$0xff] }
 0x22b   :  { %1230 = vmatpush.msrb.mxu1 %v1221_v16  ;;  %1716 = vmatpush.msra.mxu3 %v1221_v16 }
 0x22c   :  { %1524 = vst.msk [vmem:[%s3409_s16 + $0x90] sm:$0xff] %vm966_vm1, %v2571_v1  ;;  %678 = vmatmul.f32.gmra.mxu3 %v473_v8 }
 0x231   :  { %v597_v58 = vpop.f32.mrf.mxu2 }
 0x232   :  { %v2581_v60 = vadd.f32 %v2279_v44, %v597_v58  ;;  %v3453_v58 = vmax.f32 %v2237_v4, 0.0 }
 0x234   :  { %1525 = vst.msk [vmem:[%s3409_s16 + $0x98] sm:$0xff] %vm966_vm1, %v2581_v60  ;;  %681 = vmatmul.f32.gmra.mxu3 %v474_v14 }
 0x239   :  { %v600_v0 = vpop.f32.mrf.mxu2 }
 0x23a   :  { %v2591_v2 = vadd.f32 %v2279_v44, %v600_v0 }
 0x23c   :  { %1526 = vst.msk [vmem:[%s3409_s16 + $0xa0] sm:$0xff] %vm966_vm1, %v2591_v2  ;;  %684 = vmatmul.f32.gmra.mxu3 %v475_v20 }
 0x241   :  { %v603_v6 = vpop.f32.mrf.mxu2 }
 0x242   :  { %v2601_v8 = vadd.f32 %v2279_v44, %v603_v6  ;;  %v3454_v6 = vmax.f32 %v2244_v13, 0.0 }
 0x244   :  { %1527 = vst.msk [vmem:[%s3409_s16 + $0xa8] sm:$0xff] %vm966_vm1, %v2601_v8  ;;  %687 = vmatmul.f32.gmra.mxu3 %v476_v26 }
 0x249   :  { %v606_v12 = vpop.f32.mrf.mxu2 }
 0x24a   :  { %v2611_v14 = vadd.f32 %v2279_v44, %v606_v12  ;;  %v1220_v12 = vld [vmem:[%s3413_s12 + $0x60] sm:$0xff] }
 0x24b   :  { %1231 = vmatpush.msrb.mxu1 %v1220_v12  ;;  %1717 = vmatpush.msra.mxu3 %v1220_v12 }
 0x24c   :  { %1528 = vst.msk [vmem:[%s3409_s16 + $0xb0] sm:$0xff] %vm966_vm1, %v2611_v14  ;;  %690 = vmatmul.f32.gmra.mxu3 %v477_v32  ;;  %v3451_v32 = vmax.f32 %v2223_v51, 0.0 }
 0x24d   :  { %1232 = vmatpush.msrb.mxu1 %v1219_v37  ;;  %1718 = vmatpush.msra.mxu3 %v1219_v37 }
 0x251   :  { %v609_v18 = vpop.f32.mrf.mxu2 }
 0x252   :  { %v2621_v20 = vadd.f32 %v2279_v44, %v609_v18 }
 0x254   :  { %1529 = vst.msk [vmem:[%s3409_s16 + $0xb8] sm:$0xff] %vm966_vm1, %v2621_v20  ;;  %693 = vmatmul.f32.gmra.mxu3 %v478_v39 }
 0x25c   :  { %696 = vmatmul.f32.gmra.mxu3 %v479_v46  ;;  %v3452_v46 = vmax.f32 %v2230_v59, 0.0 }
 0x25f   :  { %v612_v26 = vpop.f32.mrf.mxu3 }
 0x260   :  { %v2636_v30 = vadd.f32 %v2279_v44, %v612_v26 }
 0x262   :  { %1530 = vst.msk [vmem:[%s3409_s16 + $0xc0] sm:$0xff] %vm966_vm1, %v2636_v30 }
 0x264   :  { %699 = vmatmul.f32.gmra.mxu3 %v3451_v32  ;;  %v3456_v32 = vmax.f32 %v2258_v31, 0.0  ;;  %v1218_v31 = vld [vmem:[%s3413_s12 + $0x50] sm:$0xff] }
 0x265   :  { %1233 = vmatpush.msrb.mxu1 %v1218_v31  ;;  %1719 = vmatpush.msra.mxu3 %v1218_v31 }
 0x267   :  { %v615_v39 = vpop.f32.mrf.mxu3 }
 0x268   :  { %v2649_v45 = vadd.f32 %v2279_v44, %v615_v39 }
 0x26a   :  { %1531 = vst.msk [vmem:[%s3409_s16 + $0xc8] sm:$0xff] %vm966_vm1, %v2649_v45 }
 0x26c   :  { %702 = vmatmul.f32.gmra.mxu3 %v3452_v46  ;;  %v3457_v46 = vmax.f32 %v2265_v40, 0.0  ;;  %v2733_v40 = vld [vmem:[%s3412_s9] ss:$0 sm:$0xff] }
 0x26f   :  { %v618_v51 = vpop.f32.mrf.mxu3 }
 0x270   :  { %v2659_v54 = vadd.f32 %v2279_v44, %v618_v51 }
 0x272   :  { %1532 = vst.msk [vmem:[%s3409_s16 + $0xd0] sm:$0xff] %vm966_vm1, %v2659_v54 }
 0x274   :  { %705 = vmatmul.f32.gmra.mxu3 %v3453_v58  ;;  %v3458_v58 = vmax.f32 %v2271_v43, 0.0  ;;  %v1217_v43 = vld [vmem:[%s3413_s12 + $0x48] sm:$0xff] }
 0x275   :  { %1234 = vmatpush.msrb.mxu1 %v1217_v43  ;;  %1720 = vmatpush.msra.mxu3 %v1217_v43 }
 0x277   :  { %v621_v59 = vpop.f32.mrf.mxu3 }
 0x278   :  { %v2672_v0 = vadd.f32 %v2279_v44, %v621_v59 }
 0x27a   :  { %1533 = vst.msk [vmem:[%s3409_s16 + $0xd8] sm:$0xff] %vm966_vm1, %v2672_v0 }
 0x27c   :  { %708 = vmatmul.f32.gmra.mxu3 %v3454_v6 }
 0x27f   :  { %v624_v4 = vpop.f32.mrf.mxu3 }
 0x280   :  { %v2685_v18 = vadd.f32 %v2279_v44, %v624_v4  ;;  %v3459_v4 = vmax.f32 %v2282_v49, 0.0 }
 0x282   :  { %1534 = vst.msk [vmem:[%s3409_s16 + $0xe0] sm:$0xff] %vm966_vm1, %v2685_v18 }
 0x284   :  { %711 = vmatmul.f32.gmra.mxu3 %v3455_v24 }
 0x287   :  { %v627_v13 = vpop.f32.mrf.mxu3 }
 0x288   :  { %v2695_v26 = vadd.f32 %v2279_v44, %v627_v13 }
 0x28a   :  { %1535 = vst.msk [vmem:[%s3409_s16 + $0xe8] sm:$0xff] %vm966_vm1, %v2695_v26 }
 0x28c   :  { %714 = vmatmul.f32.gmra.mxu3 %v3456_v32  ;;  %v865_v32 = vld [vmem:[%s3415_s1] sm:$0xff] }
 0x28f   :  { %v630_v39 = vpop.f32.mrf.mxu3 }
 0x290   :  { %v2708_v22 = vadd.f32 %v2279_v44, %v630_v39 }
 0x292   :  { %1536 = vst.msk [vmem:[%s3409_s16 + $0xf0] sm:$0xff] %vm966_vm1, %v2708_v22 }
 0x294   :  { %717 = vmatmul.f32.gmra.mxu3 %v3457_v46  ;;  %v3460_v46 = vmax.f32 %v2296_v57, 0.0  ;;  %v866_v57 = vld [vmem:[%s3415_s1 + $0x8] sm:$0xff] }
 0x297   :  { %v633_v51 = vpop.f32.mrf.mxu3 }
 0x298   :  { %v2721_v16 = vadd.f32 %v2279_v44, %v633_v51  ;;  %v1216_v51 = vld [vmem:[%s3413_s12 + $0x40] sm:$0xff] }
 0x299   :  { %1235 = vmatpush.msrb.mxu1 %v1216_v51  ;;  %1721 = vmatpush.msra.mxu3 %v1216_v51 }
 0x29a   :  { %1537 = vst.msk [vmem:[%s3409_s16 + $0xf8] sm:$0xff] %vm966_vm1, %v2721_v16 }
 0x29c   :  { %720 = vmatmul.f32.gmra.mxu3 %v3458_v58 }
 0x29f   :  { %v673_v59 = vpop.f32.mrf.mxu3 }
 0x2a0   :  { %v674_v6 = vadd.f32 %v2733_v40, %v673_v59 }
 0x2a2   :  { %v769_v12 = vmul.f32 0.5, %v674_v6  ;;  %1538 = vst.msk [vmem:[%s3414_s17] sm:$0xff] %vm966_vm1, %v674_v6 }
 0x2a4   :  { %v801_v44 = vmul.f32 1.442695, %v769_v12  ;;  %723 = vmatmul.f32.gmra.mxu3 %v3459_v4 }
 0x2a6   :  { %1737 = vpow2.f32 %v801_v44 }
 0x2a7   :  { %v676_v24 = vpop.f32.mrf.mxu3 }
 0x2a8   :  { %v677_v13 = vadd.f32 %v2733_v40, %v676_v24 }
 0x2aa   :  { %v770_v37 = vmul.f32 0.5, %v677_v13  ;;  %1539 = vst.msk [vmem:[%s3414_s17 + $0x8] sm:$0xff] %vm966_vm1, %v677_v13 }
 0x2ac   :  { %v1738_v49 = vpop.eup %1737  ;;  %v803_v39 = vmul.f32 1.442695, %v770_v37  ;;  %726 = vmatmul.f32.gmra.mxu3 %v3460_v46  ;;  %v3462_v46 = vmax.f32 %v2324_v17, 0.0  ;;  %v868_v17 = vld [vmem:[%s3415_s1 + $0x18] sm:$0xff] }
 0x2ad   :  { %v897_v31 = vmul.f32 %v1738_v49, %v865_v32 }
 0x2ae   :  { %1739 = vpow2.f32 %v803_v39 }
 0x2af   :  { %v679_v58 = vpop.f32.mrf.mxu3  ;;  %v929_v59 = vadd.f32 %v897_v31, %v2285_v50  ;;  %v3461_v50 = vmax.f32 %v2310_v7, 0.0  ;;  %v867_v7 = vld [vmem:[%s3415_s1 + $0x10] sm:$0xff]  ;;  %v1215_v31 = vld [vmem:[%s3413_s12 + $0x38] sm:$0xff] }
 0x2b0   :  { %v680_v6 = vadd.f32 %v2733_v40, %v679_v58  ;;  %1236 = vmatpush.msrb.mxu1 %v1215_v31  ;;  %1722 = vmatpush.msra.mxu3 %v1215_v31 }
 0x2b1   :  { %1646 = vmatmul.msk.f32.vlgmr.msrb.gmra.mxu0 %vm966_vm1, %v929_v59 }
 0x2b2   :  { %v771_v12 = vmul.f32 0.5, %v680_v6  ;;  %1540 = vst.msk [vmem:[%s3414_s17 + $0x10] sm:$0xff] %vm966_vm1, %v680_v6 }
 0x2b4   :  { %v1740_v44 = vpop.eup %1739  ;;  %v805_v4 = vmul.f32 1.442695, %v771_v12  ;;  %729 = vmatmul.f32.gmra.mxu3 %v3461_v50 }
 0x2b5   :  { %v898_v43 = vmul.f32 %v1740_v44, %v866_v57 }
 0x2b6   :  { %1741 = vpow2.f32 %v805_v4  ;;  %v1214_v4 = vld [vmem:[%s3413_s12 + $0x30] sm:$0xff] }
 0x2b7   :  { %v682_v24 = vpop.f32.mrf.mxu3  ;;  %v930_v13 = vadd.f32 %v898_v43, %v2299_v61  ;;  %1237 = vmatpush.msrb.mxu1 %v1214_v4  ;;  %1723 = vmatpush.msra.mxu3 %v1214_v4 }
 0x2b8   :  { %v683_v32 = vadd.f32 %v2733_v40, %v682_v24 }
 0x2b9   :  { %1647 = vmatmul.msk.f32.gmra.mxu0 %vm966_vm1, %v930_v13 }
 0x2ba   :  { %v772_v37 = vmul.f32 0.5, %v683_v32  ;;  %1541 = vst.msk [vmem:[%s3414_s17 + $0x18] sm:$0xff] %vm966_vm1, %v683_v32 }
 0x2bc   :  { %v1742_v49 = vpop.eup %1741  ;;  %v807_v39 = vmul.f32 1.442695, %v772_v37  ;;  %732 = vmatmul.f32.gmra.mxu3 %v3462_v46 }
 0x2bd   :  { %v899_v61 = vmul.f32 %v1742_v49, %v867_v7 }
 0x2be   :  { %1743 = vpow2.f32 %v807_v39 }
 0x2bf   :  { %v685_v51 = vpop.f32.mrf.mxu3  ;;  %v931_v58 = vadd.f32 %v899_v61, %v2313_v9  ;;  %v3463_v9 = vmax.f32 %v2338_v28, 0.0  ;;  %v869_v28 = vld [vmem:[%s3415_s1 + $0x20] sm:$0xff] }
 0x2c0   :  { %v686_v59 = vadd.f32 %v2733_v40, %v685_v51 }
 0x2c1   :  { %1648 = vmatmul.msk.f32.gmra.mxu0 %vm966_vm1, %v931_v58  ;;  %v3465_v58 = vmax.f32 %v2381_v27, 0.0  ;;  %v871_v27 = vld [vmem:[%s3415_s1 + $0x30] sm:$0xff] }
 0x2c2   :  { %v773_v6 = vmul.f32 0.5, %v686_v59  ;;  %1542 = vst.msk [vmem:[%s3414_s17 + $0x20] sm:$0xff] %vm966_vm1, %v686_v59  ;;  %v1213_v59 = vld [vmem:[%s3413_s12 + $0x28] sm:$0xff] }
 0x2c3   :  { %1238 = vmatpush.msrb.mxu1 %v1213_v59  ;;  %1724 = vmatpush.msra.mxu3 %v1213_v59 }
 0x2c4   :  { %v1744_v12 = vpop.eup %1743  ;;  %v809_v57 = vmul.f32 1.442695, %v773_v6  ;;  %735 = vmatmul.f32.gmra.mxu3 %v3463_v9 }
 0x2c5   :  { %v900_v44 = vmul.f32 %v1744_v12, %v868_v17 }
 0x2c6   :  { %1745 = vpow2.f32 %v809_v57 }
 0x2c7   :  { %v688_v50 = vpop.f32.mrf.mxu3  ;;  %v932_v43 = vadd.f32 %v900_v44, %v2327_v19  ;;  %v3464_v19 = vmax.f32 %v2358_v48, 0.0  ;;  %v870_v48 = vld [vmem:[%s3415_s1 + $0x28] sm:$0xff] }
 0x2c8   :  { %v689_v24 = vadd.f32 %v2733_v40, %v688_v50  ;;  %v1388_v50 = vld [vmem:[%s3417_s14 + $0x78] sm:$0xff] }
 0x2c9   :  { %1649 = vmatmul.msk.f32.gmra.mxu0 %vm966_vm1, %v932_v43  ;;  %v1212_v43 = vld [vmem:[%s3413_s12 + $0x20] sm:$0xff]  ;;  %1393 = vmatpush.msrb.mxu2 %v1388_v50 }
 0x2ca   :  { %v774_v13 = vmul.f32 0.5, %v689_v24  ;;  %1543 = vst.msk [vmem:[%s3414_s17 + $0x28] sm:$0xff] %vm966_vm1, %v689_v24  ;;  %1239 = vmatpush.msrb.mxu1 %v1212_v43  ;;  %1725 = vmatpush.msra.mxu3 %v1212_v43 }
 0x2cc   :  { %v1746_v32 = vpop.eup %1745  ;;  %v811_v37 = vmul.f32 1.442695, %v774_v13  ;;  %738 = vmatmul.f32.gmra.mxu3 %v3464_v19 }
 0x2cd   :  { %v901_v7 = vmul.f32 %v1746_v32, %v869_v28  ;;  %v872_v32 = vld [vmem:[%s3415_s1 + $0x38] sm:$0xff] }
 0x2ce   :  { %1747 = vpow2.f32 %v811_v37 }
 0x2cf   :  { %v691_v49 = vpop.f32.mrf.mxu3  ;;  %v933_v39 = vadd.f32 %v901_v7, %v2341_v29 }
 0x2d0   :  { %v692_v46 = vadd.f32 %v2733_v40, %v691_v49 }
 0x2d1   :  { %1650 = vmatmul.msk.f32.gmra.mxu0 %vm966_vm1, %v933_v39 }
 0x2d2   :  { %v775_v61 = vmul.f32 0.5, %v692_v46  ;;  %1544 = vst.msk [vmem:[%s3414_s17 + $0x30] sm:$0xff] %vm966_vm1, %v692_v46 }
 0x2d4   :  { %v1748_v31 = vpop.eup %1747  ;;  %v813_v51 = vmul.f32 1.442695, %v775_v61  ;;  %741 = vmatmul.f32.gmra.mxu3 %v3465_v58  ;;  %v1387_v58 = vld [vmem:[%s3417_s14 + $0x70] sm:$0xff] }
 0x2d5   :  { %v902_v29 = vmul.f32 %v1748_v31, %v870_v48  ;;  %1394 = vmatpush.msrb.mxu2 %v1387_v58 }
 0x2d6   :  { %1749 = vpow2.f32 %v813_v51  ;;  %v3468_v51 = vmax.f32 %v2452_v56, 0.0 }
 0x2d7   :  { %v694_v6 = vpop.f32.mrf.mxu3  ;;  %v934_v17 = vadd.f32 %v902_v29, %v2361_v55  ;;  %v3466_v55 = vmax.f32 %v2412_v25, 0.0  ;;  %v1211_v29 = vld [vmem:[%s3413_s12 + $0x18] sm:$0xff] }
 0x2d8   :  { %v695_v12 = vadd.f32 %v2733_v40, %v694_v6  ;;  %1240 = vmatpush.msrb.mxu1 %v1211_v29  ;;  %1726 = vmatpush.msra.mxu3 %v1211_v29 }
 0x2d9   :  { %1651 = vmatmul.msk.f32.gmra.mxu0 %vm966_vm1, %v934_v17 }
 0x2da   :  { %v776_v57 = vmul.f32 0.5, %v695_v12  ;;  %1545 = vst.msk [vmem:[%s3414_s17 + $0x38] sm:$0xff] %vm966_vm1, %v695_v12  ;;  %v874_v12 = vld [vmem:[%s3415_s1 + $0x48] sm:$0xff] }
 0x2dc   :  { %v1750_v9 = vpop.eup %1749  ;;  %v815_v44 = vmul.f32 1.442695, %v776_v57  ;;  %744 = vmatmul.f32.gmra.mxu3 %v3466_v55  ;;  %v1210_v55 = vld [vmem:[%s3413_s12 + $0x10] sm:$0xff] }
 0x2dd   :  { %v903_v4 = vmul.f32 %v1750_v9, %v871_v27  ;;  %1241 = vmatpush.msrb.mxu1 %v1210_v55  ;;  %1727 = vmatpush.msra.mxu3 %v1210_v55 }
 0x2de   :  { %1751 = vpow2.f32 %v815_v44  ;;  %v1386_v44 = vld [vmem:[%s3417_s14 + $0x68] sm:$0xff] }
 0x2df   :  { %v697_v24 = vpop.f32.mrf.mxu3  ;;  %v935_v13 = vadd.f32 %v903_v4, %v2384_v35  ;;  %v3467_v35 = vmax.f32 %v2432_v42, 0.0  ;;  %v873_v42 = vld [vmem:[%s3415_s1 + $0x40] sm:$0xff]  ;;  %1395 = vmatpush.msrb.mxu2 %v1386_v44 }
 0x2e0   :  { %v698_v28 = vadd.f32 %v2733_v40, %v697_v24  ;;  %v875_v24 = vld [vmem:[%s3415_s1 + $0x50] sm:$0xff] }
 0x2e1   :  { %1652 = vmatmul.msk.f32.gmra.mxu0 %vm966_vm1, %v935_v13 }
 0x2e2   :  { %v777_v25 = vmul.f32 0.5, %v698_v28  ;;  %1546 = vst.msk [vmem:[%s3414_s17 + $0x40] sm:$0xff] %vm966_vm1, %v698_v28 }
 0x2e4   :  { %v1752_v37 = vpop.eup %1751  ;;  %v817_v19 = vmul.f32 1.442695, %v777_v25  ;;  %747 = vmatmul.f32.gmra.mxu3 %v3467_v35 }
 0x2e5   :  { %v904_v7 = vmul.f32 %v1752_v37, %v872_v32 }
 0x2e6   :  { %1753 = vpow2.f32 %v817_v19 }
 0x2e7   :  { %v700_v49 = vpop.f32.mrf.mxu3  ;;  %v936_v39 = vadd.f32 %v904_v7, %v2401_v3 }
 0x2e8   :  { %v701_v46 = vadd.f32 %v2733_v40, %v700_v49 }
 0x2e9   :  { %1653 = vmatmul.msk.f32.gmra.mxu0 %vm966_vm1, %v936_v39  ;;  %v3471_v39 = vmax.f32 %v2509_v63, 0.0 }
 0x2ea   :  { %v778_v61 = vmul.f32 0.5, %v701_v46  ;;  %1547 = vst.msk [vmem:[%s3414_s17 + $0x48] sm:$0xff] %vm966_vm1, %v701_v46  ;;  %v1385_v46 = vld [vmem:[%s3417_s14 + $0x60] sm:$0xff] }
 0x2eb   :  { %1396 = vmatpush.msrb.mxu2 %v1385_v46 }
 0x2ec   :  { %v1754_v48 = vpop.eup %1753  ;;  %v819_v31 = vmul.f32 1.442695, %v778_v61  ;;  %750 = vmatmul.f32.gmra.mxu3 %v3468_v51  ;;  %v1209_v61 = vld [vmem:[%s3413_s12 + $0x8] sm:$0xff]  ;;  %v877_v51 = vld [vmem:[%s3415_s1 + $0x60] sm:$0xff] }
 0x2ed   :  { %v905_v3 = vmul.f32 %v1754_v48, %v873_v42  ;;  %1242 = vmatpush.msrb.mxu1 %v1209_v61  ;;  %1728 = vmatpush.msra.mxu3 %v1209_v61 }
 0x2ee   :  { %1755 = vpow2.f32 %v819_v31 }
 0x2ef   :  { %v703_v59 = vpop.f32.mrf.mxu3  ;;  %v937_v6 = vadd.f32 %v905_v3, %v2419_v38  ;;  %v3469_v38 = vmax.f32 %v2472_v21, 0.0 }
 0x2f0   :  { %v704_v17 = vadd.f32 %v2733_v40, %v703_v59  ;;  %v1384_v59 = vld [vmem:[%s3417_s14 + $0x58] sm:$0xff] }
 0x2f1   :  { %1654 = vmatmul.msk.f32.gmra.mxu0 %vm966_vm1, %v937_v6  ;;  %v1208_v6 = vld [vmem:[%s3413_s12] sm:$0xff]  ;;  %1397 = vmatpush.msrb.mxu2 %v1384_v59 }
 0x2f2   :  { %v779_v56 = vmul.f32 0.5, %v704_v17  ;;  %1548 = vst.msk [vmem:[%s3414_s17 + $0x50] sm:$0xff] %vm966_vm1, %v704_v17  ;;  %1243 = vmatpush.msrb.mxu1 %v1208_v6  ;;  %1729 = vmatpush.msra.mxu3 %v1208_v6  ;;  %v1381_v6 = vld [vmem:[%s3417_s14 + $0x40] sm:$0xff] }
 0x2f4   :  { %v1756_v57 = vpop.eup %1755  ;;  %v821_v27 = vmul.f32 1.442695, %v779_v56  ;;  %753 = vmatmul.f32.gmra.mxu3 %v3469_v38 }
 0x2f5   :  { %v906_v9 = vmul.f32 %v1756_v57, %v874_v12  ;;  %v878_v57 = vld [vmem:[%s3415_s1 + $0x68] sm:$0xff] }
 0x2f6   :  { %1757 = vpow2.f32 %v821_v27 }
 0x2f7   :  { %v706_v4 = vpop.f32.mrf.mxu3  ;;  %v938_v50 = vadd.f32 %v906_v9, %v2438_v34  ;;  %v3470_v34 = vmax.f32 %v2495_v47, 0.0  ;;  %v876_v47 = vld [vmem:[%s3415_s1 + $0x58] sm:$0xff] }
 0x2f8   :  { %v707_v43 = vadd.f32 %v2733_v40, %v706_v4 }
 0x2f9   :  { %1655 = vmatmul.msk.f32.gmra.mxu0 %vm966_vm1, %v938_v50 }
 0x2fa   :  { %v780_v21 = vmul.f32 0.5, %v707_v43  ;;  %1549 = vst.msk [vmem:[%s3414_s17 + $0x58] sm:$0xff] %vm966_vm1, %v707_v43 }
 0x2fc   :  { %v1758_v13 = vpop.eup %1757  ;;  %v823_v28 = vmul.f32 1.442695, %v780_v21  ;;  %756 = vmatmul.f32.gmra.mxu3 %v3470_v34  ;;  %v880_v34 = vld [vmem:[%s3415_s1 + $0x78] sm:$0xff] }
 0x2fd   :  { %v907_v25 = vmul.f32 %v1758_v13, %v875_v24 }
 0x2fe   :  { %1759 = vpow2.f32 %v823_v28 }
 0x2ff   :  { %v709_v32 = vpop.f32.mrf.mxu3  ;;  %v939_v37 = vadd.f32 %v907_v25, %v2458_v10 }
 0x300   :  { %v710_v19 = vadd.f32 %v2733_v40, %v709_v32 }
 0x301   :  { %1656 = vmatmul.msk.f32.gmra.mxu0 %vm966_vm1, %v939_v37 }
 0x302   :  { %v781_v35 = vmul.f32 0.5, %v710_v19  ;;  %1550 = vst.msk [vmem:[%s3414_s17 + $0x60] sm:$0xff] %vm966_vm1, %v710_v19 }
 0x304   :  { %v1760_v7 = vpop.eup %1759  ;;  %v825_v49 = vmul.f32 1.442695, %v781_v35  ;;  %759 = vmatmul.f32.gmra.mxu3 %v3471_v39  ;;  %v2992_v39 = vld [vmem:[%s3416_s11] ss:$0 sm:$0xff] }
 0x305   :  { %v908_v10 = vmul.f32 %v1760_v7, %v876_v47 }
 0x306   :  { %1761 = vpow2.f32 %v825_v49  ;;  %v881_v49 = vld [vmem:[%s3415_s1 + $0x80] sm:$0xff] }
 0x307   :  { %v712_v42 = vpop.f32.mrf.mxu3  ;;  %v940_v48 = vadd.f32 %v908_v10, %v2478_v52  ;;  %v3472_v52 = vmax.f32 %v2523_v23, 0.0 }
 0x308   :  { %v713_v31 = vadd.f32 %v2733_v40, %v712_v42 }
 0x309   :  { %1657 = vmatmul.msk.f32.gmra.mxu0 %vm966_vm1, %v940_v48 }
 0x30a   :  { %v782_v63 = vmul.f32 0.5, %v713_v31  ;;  %1551 = vst.msk [vmem:[%s3414_s17 + $0x68] sm:$0xff] %vm966_vm1, %v713_v31 }
 0x30c   :  { %v1762_v3 = vpop.eup %1761  ;;  %v827_v58 = vmul.f32 1.442695, %v782_v63  ;;  %762 = vmatmul.f32.gmra.mxu3 %v3472_v52 }
 0x30d   :  { %v909_v29 = vmul.f32 %v1762_v3, %v877_v51 }
 0x30e   :  { %1763 = vpow2.f32 %v827_v58  ;;  %v882_v58 = vld [vmem:[%s3415_s1 + $0x88] sm:$0xff] }
 0x30f   :  { %v715_v17 = vpop.f32.mrf.mxu3  ;;  %v941_v56 = vadd.f32 %v909_v29, %v2498_v41 }
 0x310   :  { %v716_v12 = vadd.f32 %v2733_v40, %v715_v17 }
 0x311   :  { %1658 = vmatmul.msk.f32.gmra.mxu0 %vm966_vm1, %v941_v56 }
 0x312   :  { %v783_v23 = vmul.f32 0.5, %v716_v12  ;;  %1552 = vst.msk [vmem:[%s3414_s17 + $0x70] sm:$0xff] %vm966_vm1, %v716_v12 }
 0x314   :  { %v1764_v27 = vpop.eup %1763  ;;  %v829_v38 = vmul.f32 1.442695, %v783_v23  ;;  %765 = vmatmul.f32.gmra.mxu3 %v502_v11 }
 0x315   :  { %v910_v41 = vmul.f32 %v1764_v27, %v878_v57 }
 0x316   :  { %1765 = vpow2.f32 %v829_v38  ;;  %v883_v38 = vld [vmem:[%s3415_s1 + $0x90] sm:$0xff] }
 0x317   :  { %v718_v9 = vpop.f32.mrf.mxu3  ;;  %v942_v44 = vadd.f32 %v910_v41, %v2512_v33  ;;  %v1383_v33 = vld [vmem:[%s3417_s14 + $0x50] sm:$0xff] }
 0x318   :  { %v719_v55 = vadd.f32 %v2733_v40, %v718_v9  ;;  %1398 = vmatpush.msrb.mxu2 %v1383_v33 }
 0x319   :  { %1659 = vmatmul.msk.f32.gmra.mxu0 %vm966_vm1, %v942_v44 }
 0x31a   :  { %v784_v4 = vmul.f32 0.5, %v719_v55  ;;  %1553 = vst.msk [vmem:[%s3414_s17 + $0x78] sm:$0xff] %vm966_vm1, %v719_v55  ;;  %v1380_v55 = vld [vmem:[%s3417_s14 + $0x38] sm:$0xff] }
 0x31c   :  { %v1766_v11 = vpop.eup %1765  ;;  %v831_v50 = vmul.f32 1.442695, %v784_v4 }
 0x31d   :  { %v911_v43 = vmul.f32 %v1766_v11, %v879_v5 }
 0x31e   :  { %1767 = vpow2.f32 %v831_v50 }
 0x31f   :  { %v721_v21 = vpop.f32.mrf.mxu3  ;;  %v943_v24 = vadd.f32 %v911_v43, %v2526_v15  ;;  %v1382_v15 = vld [vmem:[%s3417_s14 + $0x48] sm:$0xff] }
 0x320   :  { %v722_v13 = vadd.f32 %v2733_v40, %v721_v21  ;;  %1399 = vmatpush.msrb.mxu2 %v1382_v15  ;;  %v884_v21 = vld [vmem:[%s3415_s1 + $0x98] sm:$0xff] }
 0x321   :  { %1660 = vmatmul.msk.f32.gmra.mxu0 %vm966_vm1, %v943_v24 }
 0x322   :  { %v785_v28 = vmul.f32 0.5, %v722_v13  ;;  %1554 = vst.msk [vmem:[%s3414_s17 + $0x80] sm:$0xff] %vm966_vm1, %v722_v13  ;;  %1400 = vmatpush.msrb.mxu2 %v1381_v6 }
 0x324   :  { %v1768_v25 = vpop.eup %1767  ;;  %v833_v32 = vmul.f32 1.442695, %v785_v28  ;;  %1401 = vmatpush.msrb.mxu2 %v1380_v55 }
 0x325   :  { %v912_v37 = vmul.f32 %v1768_v25, %v880_v34 }
 0x326   :  { %1769 = vpow2.f32 %v833_v32 }
 0x327   :  { %v724_v19 = vpop.f32.mrf.mxu3  ;;  %v944_v35 = vadd.f32 %v912_v37, %v2540_v62 }
 0x328   :  { %v725_v47 = vadd.f32 %v2733_v40, %v724_v19 }
 0x329   :  { %1661 = vmatmul.msk.f32.gmra.mxu0 %vm966_vm1, %v944_v35  ;;  %v885_v35 = vld [vmem:[%s3415_s1 + $0xa0] sm:$0xff] }
 0x32a   :  { %v786_v7 = vmul.f32 0.5, %v725_v47  ;;  %1555 = vst.msk [vmem:[%s3414_s17 + $0x88] sm:$0xff] %vm966_vm1, %v725_v47 }
 0x32c   :  { %v1770_v62 = vpop.eup %1769  ;;  %v835_v10 = vmul.f32 1.442695, %v786_v7 }
 0x32d   :  { %v913_v46 = vmul.f32 %v1770_v62, %v881_v49  ;;  %v1379_v62 = vld [vmem:[%s3417_s14 + $0x30] sm:$0xff] }
 0x32e   :  { %1771 = vpow2.f32 %v835_v10  ;;  %v1080_v61 = vpop.f32.mrf.mxu0  ;;  %1402 = vmatpush.msrb.mxu2 %v1379_v62  ;;  %v890_v62 = vld [vmem:[%s3415_s1 + $0xc8] sm:$0xff] }
 0x32f   :  { %v1081_v42 = vadd.f32 %v2992_v39, %v1080_v61  ;;  %v727_v48 = vpop.f32.mrf.mxu3  ;;  %v945_v31 = vadd.f32 %v913_v46, %v2551_v53 }
 0x330   :  { %v728_v63 = vadd.f32 %v2733_v40, %v727_v48 }
 0x331   :  { %v1176_v51 = vmax.f32 %v1081_v42, 0.0  ;;  %1662 = vmatmul.msk.f32.gmra.mxu0 %vm966_vm1, %v945_v31 }
 0x332   :  { %v787_v3 = vmul.f32 0.5, %v728_v63  ;;  %1556 = vst.msk [vmem:[%s3414_s17 + $0x90] sm:$0xff] %vm966_vm1, %v728_v63  ;;  %v886_v63 = vld [vmem:[%s3415_s1 + $0xa8] sm:$0xff] }
 0x333   :  { %1244 = vmatmul.f32.vlgmr.msrb.gmra.mxu1 %v1176_v51 }
 0x334   :  { %v1772_v52 = vpop.eup %1771  ;;  %v837_v29 = vmul.f32 1.442695, %v787_v3 }
 0x335   :  { %v914_v59 = vmul.f32 %v1772_v52, %v882_v58  ;;  %v1378_v52 = vld [vmem:[%s3417_s14 + $0x28] sm:$0xff] }
 0x336   :  { %1773 = vpow2.f32 %v837_v29  ;;  %v1083_v53 = vpop.f32.mrf.mxu0  ;;  %1403 = vmatpush.msrb.mxu2 %v1378_v52 }
 0x337   :  { %v1084_v17 = vadd.f32 %v2992_v39, %v1083_v53  ;;  %v730_v56 = vpop.f32.mrf.mxu3  ;;  %v946_v12 = vadd.f32 %v914_v59, %v2561_v36 }
 0x338   :  { %v731_v23 = vadd.f32 %v2733_v40, %v730_v56 }
 0x339   :  { %v1177_v57 = vmax.f32 %v1084_v17, 0.0  ;;  %1663 = vmatmul.msk.f32.gmra.mxu0 %vm966_vm1, %v946_v12  ;;  %v887_v12 = vld [vmem:[%s3415_s1 + $0xb0] sm:$0xff] }
 0x33a   :  { %v788_v27 = vmul.f32 0.5, %v731_v23  ;;  %1557 = vst.msk [vmem:[%s3414_s17 + $0x98] sm:$0xff] %vm966_vm1, %v731_v23 }
 0x33b   :  { %1247 = vmatmul.f32.gmra.mxu1 %v1177_v57 }
 0x33c   :  { %v1774_v41 = vpop.eup %1773  ;;  %v839_v9 = vmul.f32 1.442695, %v788_v27 }
 0x33d   :  { %v915_v36 = vmul.f32 %v1774_v41, %v883_v38 }
 0x33e   :  { %1775 = vpow2.f32 %v839_v9  ;;  %v1086_v44 = vpop.f32.mrf.mxu0 }
 0x33f   :  { %v1087_v4 = vadd.f32 %v2992_v39, %v1086_v44  ;;  %v733_v5 = vpop.f32.mrf.mxu3  ;;  %v947_v11 = vadd.f32 %v915_v36, %v2571_v1 }
 0x340   :  { %v734_v50 = vadd.f32 %v2733_v40, %v733_v5 }
 0x341   :  { %v1178_v43 = vmax.f32 %v1087_v4, 0.0  ;;  %1664 = vmatmul.msk.f32.gmra.mxu0 %vm966_vm1, %v947_v11  ;;  %v888_v4 = vld [vmem:[%s3415_s1 + $0xb8] sm:$0xff] }
 0x342   :  { %v789_v33 = vmul.f32 0.5, %v734_v50  ;;  %1558 = vst.msk [vmem:[%s3414_s17 + $0xa0] sm:$0xff] %vm966_vm1, %v734_v50 }
 0x343   :  { %1250 = vmatmul.f32.gmra.mxu1 %v1178_v43  ;;  %v1377_v43 = vld [vmem:[%s3417_s14 + $0x20] sm:$0xff] }
 0x344   :  { %v1776_v24 = vpop.eup %1775  ;;  %v841_v13 = vmul.f32 1.442695, %v789_v33  ;;  %1404 = vmatpush.msrb.mxu2 %v1377_v43 }
 0x345   :  { %v916_v1 = vmul.f32 %v1776_v24, %v884_v21 }
 0x346   :  { %1777 = vpow2.f32 %v841_v13  ;;  %v1089_v28 = vpop.f32.mrf.mxu0 }
 0x347   :  { %v1090_v34 = vadd.f32 %v2992_v39, %v1089_v28  ;;  %v736_v25 = vpop.f32.mrf.mxu3  ;;  %v948_v32 = vadd.f32 %v916_v1, %v2581_v60 }
 0x348   :  { %v737_v37 = vadd.f32 %v2733_v40, %v736_v25 }
 0x349   :  { %v1179_v15 = vmax.f32 %v1090_v34, 0.0  ;;  %1665 = vmatmul.msk.f32.gmra.mxu0 %vm966_vm1, %v948_v32  ;;  %v889_v34 = vld [vmem:[%s3415_s1 + $0xc0] sm:$0xff] }
 0x34a   :  { %v790_v19 = vmul.f32 0.5, %v737_v37  ;;  %1559 = vst.msk [vmem:[%s3414_s17 + $0xa8] sm:$0xff] %vm966_vm1, %v737_v37 }
 0x34b   :  { %1253 = vmatmul.f32.gmra.mxu1 %v1179_v15  ;;  %v1376_v15 = vld [vmem:[%s3417_s14 + $0x18] sm:$0xff] }
 0x34c   :  { %v1778_v47 = vpop.eup %1777  ;;  %v843_v7 = vmul.f32 1.442695, %v790_v19  ;;  %1405 = vmatpush.msrb.mxu2 %v1376_v15 }
 0x34d   :  { %v917_v49 = vmul.f32 %v1778_v47, %v885_v35 }
 0x34e   :  { %1779 = vpow2.f32 %v843_v7  ;;  %v1092_v60 = vpop.f32.mrf.mxu0 }
 0x34f   :  { %v1093_v10 = vadd.f32 %v2992_v39, %v1092_v60  ;;  %v739_v46 = vpop.f32.mrf.mxu3  ;;  %v949_v61 = vadd.f32 %v917_v49, %v2591_v2 }
 0x350   :  { %v740_v42 = vadd.f32 %v2733_v40, %v739_v46 }
 0x351   :  { %v1180_v48 = vmax.f32 %v1093_v10, 0.0  ;;  %1666 = vmatmul.msk.f32.gmra.mxu0 %vm966_vm1, %v949_v61 }
 0x352   :  { %v791_v31 = vmul.f32 0.5, %v740_v42  ;;  %1560 = vst.msk [vmem:[%s3414_s17 + $0xb0] sm:$0xff] %vm966_vm1, %v740_v42 }
 0x353   :  { %1256 = vmatmul.f32.gmra.mxu1 %v1180_v48 }
 0x354   :  { %v1780_v51 = vpop.eup %1779  ;;  %v845_v3 = vmul.f32 1.442695, %v791_v31 }
 0x355   :  { %v918_v2 = vmul.f32 %v1780_v51, %v886_v63 }
 0x356   :  { %1781 = vpow2.f32 %v845_v3  ;;  %v1095_v58 = vpop.f32.mrf.mxu0 }
 0x357   :  { %v1096_v29 = vadd.f32 %v2992_v39, %v1095_v58  ;;  %v742_v59 = vpop.f32.mrf.mxu3  ;;  %v950_v53 = vadd.f32 %v918_v2, %v2601_v8  ;;  %v891_v2 = vld [vmem:[%s3415_s1 + $0xd0] sm:$0xff] }
 0x358   :  { %v743_v6 = vadd.f32 %v2733_v40, %v742_v59  ;;  %v1375_v59 = vld [vmem:[%s3417_s14 + $0x10] sm:$0xff] }
 0x359   :  { %v1181_v17 = vmax.f32 %v1096_v29, 0.0  ;;  %1667 = vmatmul.msk.f32.gmra.mxu0 %vm966_vm1, %v950_v53  ;;  %1406 = vmatpush.msrb.mxu2 %v1375_v59 }
 0x35a   :  { %v792_v56 = vmul.f32 0.5, %v743_v6  ;;  %1561 = vst.msk [vmem:[%s3414_s17 + $0xb8] sm:$0xff] %vm966_vm1, %v743_v6 }
 0x35b   :  { %1259 = vmatmul.f32.gmra.mxu1 %v1181_v17 }
 0x35c   :  { %v1782_v23 = vpop.eup %1781  ;;  %v847_v57 = vmul.f32 1.442695, %v792_v56 }
 0x35d   :  { %v919_v8 = vmul.f32 %v1782_v23, %v887_v12 }
 0x35e   :  { %1783 = vpow2.f32 %v847_v57  ;;  %v1098_v27 = vpop.f32.mrf.mxu0  ;;  %v892_v57 = vld [vmem:[%s3415_s1 + $0xd8] sm:$0xff] }
 0x35f   :  { %v1099_v38 = vadd.f32 %v2992_v39, %v1098_v27  ;;  %v745_v41 = vpop.f32.mrf.mxu3  ;;  %v951_v9 = vadd.f32 %v919_v8, %v2611_v14 }
 0x360   :  { %v746_v36 = vadd.f32 %v2733_v40, %v745_v41 }
 0x361   :  { %v1182_v44 = vmax.f32 %v1099_v38, 0.0  ;;  %1668 = vmatmul.msk.f32.gmra.mxu0 %vm966_vm1, %v951_v9 }
 0x362   :  { %v793_v55 = vmul.f32 0.5, %v746_v36  ;;  %1562 = vst.msk [vmem:[%s3414_s17 + $0xc0] sm:$0xff] %vm966_vm1, %v746_v36 }
 0x363   :  { %1262 = vmatmul.f32.gmra.mxu1 %v1182_v44 }
 0x364   :  { %v1784_v5 = vpop.eup %1783  ;;  %v849_v11 = vmul.f32 1.442695, %v793_v55 }
 0x365   :  { %v920_v50 = vmul.f32 %v1784_v5, %v888_v4 }
 0x366   :  { %1785 = vpow2.f32 %v849_v11  ;;  %v1101_v14 = vpop.f32.mrf.mxu0  ;;  %v893_v11 = vld [vmem:[%s3415_s1 + $0xe0] sm:$0xff] }
 0x367   :  { %v1102_v33 = vadd.f32 %v2992_v39, %v1101_v14  ;;  %v748_v21 = vpop.f32.mrf.mxu3  ;;  %v952_v24 = vadd.f32 %v920_v50, %v2621_v20 }
 0x368   :  { %v749_v13 = vadd.f32 %v2733_v40, %v748_v21 }
 0x369   :  { %v1183_v1 = vmax.f32 %v1102_v33, 0.0  ;;  %1669 = vmatmul.msk.f32.gmra.mxu0 %vm966_vm1, %v952_v24 }
 0x36a   :  { %v794_v28 = vmul.f32 0.5, %v749_v13  ;;  %1563 = vst.msk [vmem:[%s3414_s17 + $0xc8] sm:$0xff] %vm966_vm1, %v749_v13 }
 0x36b   :  { %1265 = vmatmul.f32.gmra.mxu1 %v1183_v1 }
 0x36c   :  { %v1786_v25 = vpop.eup %1785  ;;  %v851_v32 = vmul.f32 1.442695, %v794_v28  ;;  %v1373_v28 = vld [vmem:[%s3417_s14] sm:$0xff] }
 0x36d   :  { %v921_v20 = vmul.f32 %v1786_v25, %v889_v34  ;;  %v894_v25 = vld [vmem:[%s3415_s1 + $0xe8] sm:$0xff] }
 0x36e   :  { %1787 = vpow2.f32 %v851_v32  ;;  %v1104_v37 = vpop.f32.mrf.mxu0 }
 0x36f   :  { %v1105_v19 = vadd.f32 %v2992_v39, %v1104_v37  ;;  %v751_v35 = vpop.f32.mrf.mxu3  ;;  %v953_v47 = vadd.f32 %v921_v20, %v2636_v30 }
 0x370   :  { %v752_v7 = vadd.f32 %v2733_v40, %v751_v35 }
 0x371   :  { %v1184_v49 = vmax.f32 %v1105_v19, 0.0  ;;  %1670 = vmatmul.msk.f32.gmra.mxu0 %vm966_vm1, %v953_v47 }
 0x372   :  { %v795_v60 = vmul.f32 0.5, %v752_v7  ;;  %1564 = vst.msk [vmem:[%s3414_s17 + $0xd0] sm:$0xff] %vm966_vm1, %v752_v7 }
 0x373   :  { %1268 = vmatmul.f32.gmra.mxu1 %v1184_v49 }
 0x374   :  { %v1788_v10 = vpop.eup %1787  ;;  %v853_v46 = vmul.f32 1.442695, %v795_v60  ;;  %v895_v60 = vld [vmem:[%s3415_s1 + $0xf0] sm:$0xff] }
 0x375   :  { %v922_v30 = vmul.f32 %v1788_v10, %v890_v62 }
 0x376   :  { %1789 = vpow2.f32 %v853_v46  ;;  %v1107_v61 = vpop.f32.mrf.mxu0 }
 0x377   :  { %v1108_v42 = vadd.f32 %v2992_v39, %v1107_v61  ;;  %v754_v48 = vpop.f32.mrf.mxu3  ;;  %v954_v31 = vadd.f32 %v922_v30, %v2649_v45 }
 0x378   :  { %v755_v63 = vadd.f32 %v2733_v40, %v754_v48 }
 0x379   :  { %v1185_v51 = vmax.f32 %v1108_v42, 0.0  ;;  %1671 = vmatmul.msk.f32.gmra.mxu0 %vm966_vm1, %v954_v31  ;;  %v896_v42 = vld [vmem:[%s3415_s1 + $0xf8] sm:$0xff] }
 0x37a   :  { %v796_v3 = vmul.f32 0.5, %v755_v63  ;;  %1565 = vst.msk [vmem:[%s3414_s17 + $0xd8] sm:$0xff] %vm966_vm1, %v755_v63 }
 0x37b   :  { %1271 = vmatmul.f32.gmra.mxu1 %v1185_v51 }
 0x37c   :  { %v1790_v58 = vpop.eup %1789  ;;  %v855_v52 = vmul.f32 1.442695, %v796_v3 }
 0x37d   :  { %v923_v29 = vmul.f32 %v1790_v58, %v891_v2 }
 0x37e   :  { %1791 = vpow2.f32 %v855_v52  ;;  %v1110_v45 = vpop.f32.mrf.mxu0 }
 0x37f   :  { %v1111_v53 = vadd.f32 %v2992_v39, %v1110_v45  ;;  %v757_v6 = vpop.f32.mrf.mxu3  ;;  %v955_v17 = vadd.f32 %v923_v29, %v2659_v54  ;;  %v1374_v54 = vld [vmem:[%s3417_s14 + $0x8] sm:$0xff] }
 0x380   :  { %v758_v56 = vadd.f32 %v2733_v40, %v757_v6  ;;  %1407 = vmatpush.msrb.mxu2 %v1374_v54 }
 0x381   :  { %v1186_v12 = vmax.f32 %v1111_v53, 0.0  ;;  %1672 = vmatmul.msk.f32.gmra.mxu0 %vm966_vm1, %v955_v17 }
 0x382   :  { %v797_v23 = vmul.f32 0.5, %v758_v56  ;;  %1566 = vst.msk [vmem:[%s3414_s17 + $0xe0] sm:$0xff] %vm966_vm1, %v758_v56  ;;  %1408 = vmatpush.msrb.mxu2 %v1373_v28 }
 0x383   :  { %1274 = vmatmul.f32.gmra.mxu1 %v1186_v12 }
 0x384   :  { %v1792_v8 = vpop.eup %1791  ;;  %v857_v27 = vmul.f32 1.442695, %v797_v23 }
 0x385   :  { %v924_v38 = vmul.f32 %v1792_v8, %v892_v57 }
 0x386   :  { %1793 = vpow2.f32 %v857_v27  ;;  %v1113_v41 = vpop.f32.mrf.mxu0 }
 0x387   :  { %v1114_v9 = vadd.f32 %v2992_v39, %v1113_v41  ;;  %v760_v36 = vpop.f32.mrf.mxu3  ;;  %v956_v44 = vadd.f32 %v924_v38, %v2672_v0 }
 0x388   :  { %v761_v55 = vadd.f32 %v2733_v40, %v760_v36 }
 0x389   :  { %v1187_v4 = vmax.f32 %v1114_v9, 0.0  ;;  %1673 = vmatmul.msk.f32.gmra.mxu0 %vm966_vm1, %v956_v44 }
 0x38a   :  { %v798_v5 = vmul.f32 0.5, %v761_v55  ;;  %1567 = vst.msk [vmem:[%s3414_s17 + $0xe8] sm:$0xff] %vm966_vm1, %v761_v55 }
 0x38b   :  { %1277 = vmatmul.f32.gmra.mxu1 %v1187_v4 }
 0x38c   :  { %v1794_v50 = vpop.eup %1793  ;;  %v859_v14 = vmul.f32 1.442695, %v798_v5 }
 0x38d   :  { %v925_v43 = vmul.f32 %v1794_v50, %v893_v11 }
 0x38e   :  { %1795 = vpow2.f32 %v859_v14  ;;  %v1116_v0 = vpop.f32.mrf.mxu0 }
 0x38f   :  { %v1117_v33 = vadd.f32 %v2992_v39, %v1116_v0  ;;  %v763_v21 = vpop.f32.mrf.mxu3  ;;  %v957_v24 = vadd.f32 %v925_v43, %v2685_v18 }
 0x390   :  { %v764_v13 = vadd.f32 %v2733_v40, %v763_v21 }
 0x391   :  { %v1188_v1 = vmax.f32 %v1117_v33, 0.0  ;;  %1674 = vmatmul.msk.f32.gmra.mxu0 %vm966_vm1, %v957_v24 }
 0x392   :  { %v799_v34 = vmul.f32 0.5, %v764_v13  ;;  %1568 = vst.msk [vmem:[%s3414_s17 + $0xf0] sm:$0xff] %vm966_vm1, %v764_v13 }
 0x393   :  { %1280 = vmatmul.f32.gmra.mxu1 %v1188_v1 }
 0x394   :  { %v1796_v18 = vpop.eup %1795  ;;  %v861_v32 = vmul.f32 1.442695, %v799_v34 }
 0x395   :  { %v926_v20 = vmul.f32 %v1796_v18, %v894_v25 }
 0x396   :  { %1797 = vpow2.f32 %v861_v32  ;;  %v1119_v37 = vpop.f32.mrf.mxu0 }
 0x397   :  { %v1120_v15 = vadd.f32 %v2992_v39, %v1119_v37  ;;  %v766_v19 = vpop.f32.mrf.mxu3  ;;  %v958_v35 = vadd.f32 %v926_v20, %v2695_v26 }
 0x398   :  { %v767_v47 = vadd.f32 %v2733_v40, %v766_v19 }
 0x399   :  { %v1189_v7 = vmax.f32 %v1120_v15, 0.0  ;;  %1675 = vmatmul.msk.f32.gmra.mxu0 %vm966_vm1, %v958_v35 }
 0x39a   :  { %v800_v49 = vmul.f32 0.5, %v767_v47  ;;  %1569 = vst.msk [vmem:[%s3414_s17 + $0xf8] sm:$0xff] %vm966_vm1, %v767_v47 }
 0x39b   :  { %1283 = vmatmul.f32.gmra.mxu1 %v1189_v7 }
 0x39c   :  { %v1798_v62 = vpop.eup %1797  ;;  %v863_v10 = vmul.f32 1.442695, %v800_v49 }
 0x39d   :  { %v927_v46 = vmul.f32 %v1798_v62, %v895_v60 }
 0x39e   :  { %1799 = vpow2.f32 %v863_v10  ;;  %v1122_v26 = vpop.f32.mrf.mxu0 }
 0x39f   :  { %v1123_v40 = vadd.f32 %v2992_v39, %v1122_v26  ;;  %v959_v30 = vadd.f32 %v927_v46, %v2708_v22  ;;  %v3187_v22 = vld [vmem:[%s3418_s13] ss:$0 sm:$0xff] }
 0x3a1   :  { %v1190_v61 = vmax.f32 %v1123_v40, 0.0  ;;  %1676 = vmatmul.msk.f32.gmra.mxu0 %vm966_vm1, %v959_v30 }
 0x3a3   :  { %1286 = vmatmul.f32.gmra.mxu1 %v1190_v61 }
 0x3a4   :  { %v1800_v48 = vpop.eup %1799 }
 0x3a5   :  { %v928_v31 = vmul.f32 %v1800_v48, %v896_v42 }
 0x3a6   :  { %v1125_v63 = vpop.f32.mrf.mxu0 }
 0x3a7   :  { %v1126_v51 = vadd.f32 %v2992_v39, %v1125_v63  ;;  %v960_v3 = vadd.f32 %v928_v31, %v2721_v16 }
 0x3a9   :  { %v1191_v2 = vmax.f32 %v1126_v51, 0.0  ;;  %1677 = vmatmul.msk.f32.gmra.mxu0 %vm966_vm1, %v960_v3 }
 0x3ab   :  { %1289 = vmatmul.f32.gmra.mxu1 %v1191_v2 }
 0x3ae   :  { %v1128_v58 = vpop.f32.mrf.mxu0 }
 0x3af   :  { %v1129_v52 = vadd.f32 %v2992_v39, %v1128_v58 }
 0x3b0   :  { %v1245_v29 = vpop.f32.mrf.mxu1 }
 0x3b1   :  { %v1192_v45 = vmax.f32 %v1129_v52, 0.0  ;;  %v1246_v59 = vadd.f32 %v3187_v22, %v1245_v29 }
 0x3b3   :  { %v1341_v53 = vmax.f32 %v1246_v59, 0.0  ;;  %1292 = vmatmul.f32.gmra.mxu1 %v1192_v45 }
 0x3b5   :  { %1409 = vmatmul.f32.vlgmr.msrb.gmra.mxu2 %v1341_v53 }
 0x3b6   :  { %v1131_v16 = vpop.f32.mrf.mxu0 }
 0x3b7   :  { %v1132_v6 = vadd.f32 %v2992_v39, %v1131_v16 }
 0x3b8   :  { %v1248_v17 = vpop.f32.mrf.mxu1 }
 0x3b9   :  { %v1193_v56 = vmax.f32 %v1132_v6, 0.0  ;;  %v1249_v12 = vadd.f32 %v3187_v22, %v1248_v17 }
 0x3bb   :  { %v1342_v23 = vmax.f32 %v1249_v12, 0.0  ;;  %1295 = vmatmul.f32.gmra.mxu1 %v1193_v56 }
 0x3bd   :  { %1412 = vmatmul.f32.gmra.mxu2 %v1342_v23 }
 0x3be   :  { %v1134_v57 = vpop.f32.mrf.mxu0 }
 0x3bf   :  { %v1135_v54 = vadd.f32 %v2992_v39, %v1134_v57 }
 0x3c0   :  { %v1251_v8 = vpop.f32.mrf.mxu1 }
 0x3c1   :  { %v1194_v27 = vmax.f32 %v1135_v54, 0.0  ;;  %v1252_v38 = vadd.f32 %v3187_v22, %v1251_v8 }
 0x3c3   :  { %v1343_v41 = vmax.f32 %v1252_v38, 0.0  ;;  %1298 = vmatmul.f32.gmra.mxu1 %v1194_v27 }
 0x3c5   :  { %1415 = vmatmul.f32.gmra.mxu2 %v1343_v41 }
 0x3c6   :  { %v1137_v9 = vpop.f32.mrf.mxu0 }
 0x3c7   :  { %v1138_v36 = vadd.f32 %v2992_v39, %v1137_v9 }
 0x3c8   :  { %v1254_v44 = vpop.f32.mrf.mxu1 }
 0x3c9   :  { %v1195_v55 = vmax.f32 %v1138_v36, 0.0  ;;  %v1255_v4 = vadd.f32 %v3187_v22, %v1254_v44 }
 0x3cb   :  { %v1344_v5 = vmax.f32 %v1255_v4, 0.0  ;;  %1301 = vmatmul.f32.gmra.mxu1 %v1195_v55 }
 0x3cd   :  { %1418 = vmatmul.f32.gmra.mxu2 %v1344_v5 }
 0x3ce   :  { %v1140_v11 = vpop.f32.mrf.mxu0 }
 0x3cf   :  { %v1141_v50 = vadd.f32 %v2992_v39, %v1140_v11 }
 0x3d0   :  { %v1257_v14 = vpop.f32.mrf.mxu1 }
 0x3d1   :  { %v1196_v43 = vmax.f32 %v1141_v50, 0.0  ;;  %v1258_v0 = vadd.f32 %v3187_v22, %v1257_v14 }
 0x3d3   :  { %v1345_v33 = vmax.f32 %v1258_v0, 0.0  ;;  %1304 = vmatmul.f32.gmra.mxu1 %v1196_v43 }
 0x3d5   :  { %1421 = vmatmul.f32.gmra.mxu2 %v1345_v33 }
 0x3d6   :  { %v1143_v21 = vpop.f32.mrf.mxu0 }
 0x3d7   :  { %v1144_v24 = vadd.f32 %v2992_v39, %v1143_v21 }
 0x3d8   :  { %v1260_v13 = vpop.f32.mrf.mxu1 }
 0x3d9   :  { %v1197_v1 = vmax.f32 %v1144_v24, 0.0  ;;  %v1261_v28 = vadd.f32 %v3187_v22, %v1260_v13 }
 0x3db   :  { %v1346_v34 = vmax.f32 %v1261_v28, 0.0  ;;  %1307 = vmatmul.f32.gmra.mxu1 %v1197_v1 }
 0x3dd   :  { %1424 = vmatmul.f32.gmra.mxu2 %v1346_v34 }
 0x3de   :  { %v1146_v25 = vpop.f32.mrf.mxu0 }
 0x3df   :  { %v1147_v18 = vadd.f32 %v2992_v39, %v1146_v25 }
 0x3e0   :  { %v1263_v32 = vpop.f32.mrf.mxu1 }
 0x3e1   :  { %v1198_v20 = vmax.f32 %v1147_v18, 0.0  ;;  %v1264_v37 = vadd.f32 %v3187_v22, %v1263_v32  ;;  %v3225_v18 = vld [vmem:[%s3419_s15] ss:$0 sm:$0xff] }
 0x3e3   :  { %v1347_v15 = vmax.f32 %v1264_v37, 0.0  ;;  %1310 = vmatmul.f32.gmra.mxu1 %v1198_v20 }
 0x3e5   :  { %1427 = vmatmul.f32.gmra.mxu2 %v1347_v15 }
 0x3e6   :  { %v1149_v19 = vpop.f32.mrf.mxu0 }
 0x3e7   :  { %v1150_v35 = vadd.f32 %v2992_v39, %v1149_v19 }
 0x3e8   :  { %v1266_v47 = vpop.f32.mrf.mxu1 }
 0x3e9   :  { %v1199_v7 = vmax.f32 %v1150_v35, 0.0  ;;  %v1267_v49 = vadd.f32 %v3187_v22, %v1266_v47 }
 0x3eb   :  { %v1348_v60 = vmax.f32 %v1267_v49, 0.0  ;;  %1313 = vmatmul.f32.gmra.mxu1 %v1199_v7 }
 0x3ed   :  { %1430 = vmatmul.f32.gmra.mxu2 %v1348_v60 }
 0x3ee   :  { %v1152_v62 = vpop.f32.mrf.mxu0 }
 0x3ef   :  { %v1153_v10 = vadd.f32 %v2992_v39, %v1152_v62 }
 0x3f0   :  { %v1269_v46 = vpop.f32.mrf.mxu1 }
 0x3f1   :  { %v1200_v26 = vmax.f32 %v1153_v10, 0.0  ;;  %v1270_v40 = vadd.f32 %v3187_v22, %v1269_v46 }
 0x3f3   :  { %v1349_v30 = vmax.f32 %v1270_v40, 0.0  ;;  %1316 = vmatmul.f32.gmra.mxu1 %v1200_v26 }
 0x3f5   :  { %1433 = vmatmul.f32.gmra.mxu2 %v1349_v30 }
 0x3f6   :  { %v1155_v61 = vpop.f32.mrf.mxu0 }
 0x3f7   :  { %v1156_v42 = vadd.f32 %v2992_v39, %v1155_v61 }
 0x3f8   :  { %v1272_v48 = vpop.f32.mrf.mxu1 }
 0x3f9   :  { %v1201_v31 = vmax.f32 %v1156_v42, 0.0  ;;  %v1273_v63 = vadd.f32 %v3187_v22, %v1272_v48 }
 0x3fb   :  { %v1350_v51 = vmax.f32 %v1273_v63, 0.0  ;;  %1319 = vmatmul.f32.gmra.mxu1 %v1201_v31 }
 0x3fd   :  { %1436 = vmatmul.f32.gmra.mxu2 %v1350_v51 }
 0x3fe   :  { %v1158_v3 = vpop.f32.mrf.mxu0 }
 0x3ff   :  { %v1159_v2 = vadd.f32 %v2992_v39, %v1158_v3 }
 0x400   :  { %v1275_v58 = vpop.f32.mrf.mxu1 }
 0x401   :  { %v1202_v52 = vmax.f32 %v1159_v2, 0.0  ;;  %v1276_v29 = vadd.f32 %v3187_v22, %v1275_v58 }
 0x403   :  { %v1351_v45 = vmax.f32 %v1276_v29, 0.0  ;;  %1322 = vmatmul.f32.gmra.mxu1 %v1202_v52 }
 0x405   :  { %1439 = vmatmul.f32.gmra.mxu2 %v1351_v45 }
 0x406   :  { %v1161_v59 = vpop.f32.mrf.mxu0 }
 0x407   :  { %v1162_v53 = vadd.f32 %v2992_v39, %v1161_v59 }
 0x408   :  { %v1278_v16 = vpop.f32.mrf.mxu1 }
 0x409   :  { %v1203_v6 = vmax.f32 %v1162_v53, 0.0  ;;  %v1279_v17 = vadd.f32 %v3187_v22, %v1278_v16 }
 0x40b   :  { %v1352_v56 = vmax.f32 %v1279_v17, 0.0  ;;  %1325 = vmatmul.f32.gmra.mxu1 %v1203_v6 }
 0x40d   :  { %1442 = vmatmul.f32.gmra.mxu2 %v1352_v56 }
 0x40e   :  { %v1164_v12 = vpop.f32.mrf.mxu0 }
 0x40f   :  { %v1165_v23 = vadd.f32 %v2992_v39, %v1164_v12 }
 0x410   :  { %v1281_v57 = vpop.f32.mrf.mxu1 }
 0x411   :  { %v1204_v54 = vmax.f32 %v1165_v23, 0.0  ;;  %v1282_v8 = vadd.f32 %v3187_v22, %v1281_v57 }
 0x413   :  { %v1353_v27 = vmax.f32 %v1282_v8, 0.0  ;;  %1328 = vmatmul.f32.gmra.mxu1 %v1204_v54 }
 0x415   :  { %1445 = vmatmul.f32.gmra.mxu2 %v1353_v27 }
 0x416   :  { %v1167_v38 = vpop.f32.mrf.mxu0 }
 0x417   :  { %v1168_v41 = vadd.f32 %v2992_v39, %v1167_v38 }
 0x418   :  { %v1284_v9 = vpop.f32.mrf.mxu1 }
 0x419   :  { %v1205_v36 = vmax.f32 %v1168_v41, 0.0  ;;  %v1285_v44 = vadd.f32 %v3187_v22, %v1284_v9 }
 0x41b   :  { %v1354_v55 = vmax.f32 %v1285_v44, 0.0  ;;  %1331 = vmatmul.f32.gmra.mxu1 %v1205_v36 }
 0x41d   :  { %1448 = vmatmul.f32.gmra.mxu2 %v1354_v55 }
 0x41e   :  { %v1170_v4 = vpop.f32.mrf.mxu0 }
 0x41f   :  { %v1171_v5 = vadd.f32 %v2992_v39, %v1170_v4 }
 0x420   :  { %v1287_v11 = vpop.f32.mrf.mxu1 }
 0x421   :  { %v1206_v50 = vmax.f32 %v1171_v5, 0.0  ;;  %v1288_v14 = vadd.f32 %v3187_v22, %v1287_v11 }
 0x423   :  { %v1355_v43 = vmax.f32 %v1288_v14, 0.0  ;;  %1334 = vmatmul.f32.gmra.mxu1 %v1206_v50 }
 0x425   :  { %1451 = vmatmul.f32.gmra.mxu2 %v1355_v43 }
 0x426   :  { %v1173_v0 = vpop.f32.mrf.mxu0 }
 0x427   :  { %v1174_v33 = vadd.f32 %v2992_v39, %v1173_v0 }
 0x428   :  { %v1290_v21 = vpop.f32.mrf.mxu1 }
 0x429   :  { %v1207_v24 = vmax.f32 %v1174_v33, 0.0  ;;  %v1291_v13 = vadd.f32 %v3187_v22, %v1290_v21 }
 0x42b   :  { %v1356_v1 = vmax.f32 %v1291_v13, 0.0  ;;  %1337 = vmatmul.f32.vlgmr.msra.gmra.mxu3 %v1207_v24 }
 0x42d   :  { %1454 = vmatmul.f32.gmra.mxu2 %v1356_v1 }
 0x430   :  { %v1293_v28 = vpop.f32.mrf.mxu1 }
 0x431   :  { %v1294_v34 = vadd.f32 %v3187_v22, %v1293_v28 }
 0x433   :  { %v1357_v25 = vmax.f32 %v1294_v34, 0.0 }
 0x435   :  { %1457 = vmatmul.f32.gmra.mxu2 %v1357_v25 }
 0x438   :  { %v1296_v32 = vpop.f32.mrf.mxu1  ;;  %v1410_v20 = vpop.f32.mrf.mxu2 }
 0x439   :  { %v1297_v39 = vadd.f32 %v3187_v22, %v1296_v32  ;;  %v1411_v37 = vadd.f32 %v3225_v18, %v1410_v20 }
 0x43b   :  { %v1358_v15 = vmax.f32 %v1297_v39, 0.0  ;;  %1570 = vst.msk [vmem:[%s3420_s18] sm:$0xff] %vm96_vm0, %v1411_v37 }
 0x43d   :  { %1460 = vmatmul.f32.gmra.mxu2 %v1358_v15 }
 0x440   :  { %v1299_v19 = vpop.f32.mrf.mxu1  ;;  %v1413_v35 = vpop.f32.mrf.mxu2 }
 0x441   :  { %v1300_v47 = vadd.f32 %v3187_v22, %v1299_v19  ;;  %v1414_v7 = vadd.f32 %v3225_v18, %v1413_v35 }
 0x443   :  { %v1359_v49 = vmax.f32 %v1300_v47, 0.0  ;;  %1571 = vst.msk [vmem:[%s3420_s18 + $0x8] sm:$0xff] %vm96_vm0, %v1414_v7 }
 0x445   :  { %1463 = vmatmul.f32.gmra.mxu2 %v1359_v49 }
 0x448   :  { %v1302_v60 = vpop.f32.mrf.mxu1  ;;  %v1416_v62 = vpop.f32.mrf.mxu2 }
 0x449   :  { %v1303_v10 = vadd.f32 %v3187_v22, %v1302_v60  ;;  %v1417_v46 = vadd.f32 %v3225_v18, %v1416_v62 }
 0x44b   :  { %v1360_v26 = vmax.f32 %v1303_v10, 0.0  ;;  %1572 = vst.msk [vmem:[%s3420_s18 + $0x10] sm:$0xff] %vm96_vm0, %v1417_v46 }
 0x44d   :  { %1466 = vmatmul.f32.gmra.mxu2 %v1360_v26 }
 0x450   :  { %v1305_v40 = vpop.f32.mrf.mxu1  ;;  %v1419_v30 = vpop.f32.mrf.mxu2 }
 0x451   :  { %v1306_v61 = vadd.f32 %v3187_v22, %v1305_v40  ;;  %v1420_v42 = vadd.f32 %v3225_v18, %v1419_v30 }
 0x453   :  { %v1361_v48 = vmax.f32 %v1306_v61, 0.0  ;;  %1573 = vst.msk [vmem:[%s3420_s18 + $0x18] sm:$0xff] %vm96_vm0, %v1420_v42 }
 0x455   :  { %1469 = vmatmul.f32.gmra.mxu2 %v1361_v48 }
 0x458   :  { %v1308_v31 = vpop.f32.mrf.mxu1  ;;  %v1422_v63 = vpop.f32.mrf.mxu2 }
 0x459   :  { %v1309_v51 = vadd.f32 %v3187_v22, %v1308_v31  ;;  %v1423_v3 = vadd.f32 %v3225_v18, %v1422_v63 }
 0x45b   :  { %v1362_v2 = vmax.f32 %v1309_v51, 0.0  ;;  %1574 = vst.msk [vmem:[%s3420_s18 + $0x20] sm:$0xff] %vm96_vm0, %v1423_v3 }
 0x45d   :  { %1472 = vmatmul.f32.gmra.mxu2 %v1362_v2 }
 0x460   :  { %v1311_v58 = vpop.f32.mrf.mxu1  ;;  %v1425_v52 = vpop.f32.mrf.mxu2 }
 0x461   :  { %v1312_v29 = vadd.f32 %v3187_v22, %v1311_v58  ;;  %v1426_v45 = vadd.f32 %v3225_v18, %v1425_v52 }
 0x463   :  { %v1363_v59 = vmax.f32 %v1312_v29, 0.0  ;;  %1575 = vst.msk [vmem:[%s3420_s18 + $0x28] sm:$0xff] %vm96_vm0, %v1426_v45 }
 0x465   :  { %1475 = vmatmul.f32.gmra.mxu2 %v1363_v59 }
 0x468   :  { %v1314_v53 = vpop.f32.mrf.mxu1  ;;  %v1428_v16 = vpop.f32.mrf.mxu2 }
 0x469   :  { %v1315_v6 = vadd.f32 %v3187_v22, %v1314_v53  ;;  %v1429_v17 = vadd.f32 %v3225_v18, %v1428_v16 }
 0x46b   :  { %v1364_v56 = vmax.f32 %v1315_v6, 0.0  ;;  %1576 = vst.msk [vmem:[%s3420_s18 + $0x30] sm:$0xff] %vm96_vm0, %v1429_v17 }
 0x46d   :  { %1478 = vmatmul.f32.gmra.mxu2 %v1364_v56 }
 0x470   :  { %v1317_v12 = vpop.f32.mrf.mxu1  ;;  %v1431_v23 = vpop.f32.mrf.mxu2 }
 0x471   :  { %v1318_v57 = vadd.f32 %v3187_v22, %v1317_v12  ;;  %v1432_v54 = vadd.f32 %v3225_v18, %v1431_v23 }
 0x473   :  { %v1365_v8 = vmax.f32 %v1318_v57, 0.0  ;;  %1577 = vst.msk [vmem:[%s3420_s18 + $0x38] sm:$0xff] %vm96_vm0, %v1432_v54 }
 0x475   :  { %1481 = vmatmul.f32.gmra.mxu2 %v1365_v8 }
 0x478   :  { %v1320_v27 = vpop.f32.mrf.mxu1  ;;  %v1434_v38 = vpop.f32.mrf.mxu2 }
 0x479   :  { %v1321_v41 = vadd.f32 %v3187_v22, %v1320_v27  ;;  %v1435_v9 = vadd.f32 %v3225_v18, %v1434_v38 }
 0x47b   :  { %v1366_v36 = vmax.f32 %v1321_v41, 0.0  ;;  %1578 = vst.msk [vmem:[%s3420_s18 + $0x40] sm:$0xff] %vm96_vm0, %v1435_v9 }
 0x47d   :  { %1484 = vmatmul.f32.gmra.mxu2 %v1366_v36 }
 0x480   :  { %v1323_v44 = vpop.f32.mrf.mxu1  ;;  %v1437_v55 = vpop.f32.mrf.mxu2 }
 0x481   :  { %v1324_v4 = vadd.f32 %v3187_v22, %v1323_v44  ;;  %v1438_v5 = vadd.f32 %v3225_v18, %v1437_v55 }
 0x483   :  { %v1367_v11 = vmax.f32 %v1324_v4, 0.0  ;;  %1579 = vst.msk [vmem:[%s3420_s18 + $0x48] sm:$0xff] %vm96_vm0, %v1438_v5 }
 0x485   :  { %1487 = vmatmul.f32.gmra.mxu2 %v1367_v11 }
 0x488   :  { %v1326_v50 = vpop.f32.mrf.mxu1  ;;  %v1440_v14 = vpop.f32.mrf.mxu2 }
 0x489   :  { %v1327_v43 = vadd.f32 %v3187_v22, %v1326_v50  ;;  %v1441_v0 = vadd.f32 %v3225_v18, %v1440_v14 }
 0x48b   :  { %v1368_v33 = vmax.f32 %v1327_v43, 0.0  ;;  %1580 = vst.msk [vmem:[%s3420_s18 + $0x50] sm:$0xff] %vm96_vm0, %v1441_v0 }
 0x48d   :  { %1490 = vmatmul.f32.gmra.mxu2 %v1368_v33 }
 0x490   :  { %v1329_v21 = vpop.f32.mrf.mxu1  ;;  %v1443_v24 = vpop.f32.mrf.mxu2 }
 0x491   :  { %v1330_v13 = vadd.f32 %v3187_v22, %v1329_v21  ;;  %v1444_v1 = vadd.f32 %v3225_v18, %v1443_v24 }
 0x493   :  { %v1369_v28 = vmax.f32 %v1330_v13, 0.0  ;;  %1581 = vst.msk [vmem:[%s3420_s18 + $0x58] sm:$0xff] %vm96_vm0, %v1444_v1 }
 0x495   :  { %1493 = vmatmul.f32.gmra.mxu2 %v1369_v28 }
 0x498   :  { %v1332_v34 = vpop.f32.mrf.mxu1  ;;  %v1446_v25 = vpop.f32.mrf.mxu2 }
 0x499   :  { %v1333_v32 = vadd.f32 %v3187_v22, %v1332_v34  ;;  %v1447_v20 = vadd.f32 %v3225_v18, %v1446_v25 }
 0x49b   :  { %v1370_v39 = vmax.f32 %v1333_v32, 0.0  ;;  %1582 = vst.msk [vmem:[%s3420_s18 + $0x60] sm:$0xff] %vm96_vm0, %v1447_v20 }
 0x49d   :  { %1496 = vmatmul.f32.gmra.mxu2 %v1370_v39 }
 0x4a0   :  { %v1335_v37 = vpop.f32.mrf.mxu1  ;;  %v1449_v15 = vpop.f32.mrf.mxu2 }
 0x4a1   :  { %v1336_v19 = vadd.f32 %v3187_v22, %v1335_v37  ;;  %v1450_v35 = vadd.f32 %v3225_v18, %v1449_v15 }
 0x4a3   :  { %v1371_v47 = vmax.f32 %v1336_v19, 0.0  ;;  %1583 = vst.msk [vmem:[%s3420_s18 + $0x68] sm:$0xff] %vm96_vm0, %v1450_v35 }
 0x4a5   :  { %1499 = vmatmul.f32.gmra.mxu2 %v1371_v47 }
 0x4a8   :  { %v1452_v7 = vpop.f32.mrf.mxu2 }
 0x4a9   :  { %v1453_v49 = vadd.f32 %v3225_v18, %v1452_v7 }
 0x4ab   :  { %1584 = vst.msk [vmem:[%s3420_s18 + $0x70] sm:$0xff] %vm96_vm0, %v1453_v49 }
 0x4ae   :  { %v1338_v60 = vpop.f32.mrf.mxu3 }
 0x4af   :  { %v1339_v62 = vadd.f32 %v3187_v22, %v1338_v60 }
 0x4b0   :  { %v1455_v10 = vpop.f32.mrf.mxu2 }
 0x4b1   :  { %v1372_v46 = vmax.f32 %v1339_v62, 0.0  ;;  %v1456_v26 = vadd.f32 %v3225_v18, %v1455_v10 }
 0x4b3   :  { %1585 = vst.msk [vmem:[%s3420_s18 + $0x78] sm:$0xff] %vm96_vm0, %v1456_v26  ;;  %1502 = vmatmul.f32.gmra.mxu2 %v1372_v46 }
 0x4b8   :  { %v1458_v40 = vpop.f32.mrf.mxu2 }
 0x4b9   :  { %v1459_v30 = vadd.f32 %v3225_v18, %v1458_v40 }
 0x4bb   :  { %1586 = vst.msk [vmem:[%s3420_s18 + $0x80] sm:$0xff] %vm96_vm0, %v1459_v30 }
 0x4c0   :  { %v1461_v61 = vpop.f32.mrf.mxu2 }
 0x4c1   :  { %v1462_v22 = vadd.f32 %v3225_v18, %v1461_v61 }
 0x4c3   :  { %1587 = vst.msk [vmem:[%s3420_s18 + $0x88] sm:$0xff] %vm96_vm0, %v1462_v22 }
 0x4c8   :  { %v1464_v42 = vpop.f32.mrf.mxu2 }
 0x4c9   :  { %v1465_v48 = vadd.f32 %v3225_v18, %v1464_v42 }
 0x4cb   :  { %1588 = vst.msk [vmem:[%s3420_s18 + $0x90] sm:$0xff] %vm96_vm0, %v1465_v48 }
 0x4d0   :  { %v1467_v31 = vpop.f32.mrf.mxu2 }
 0x4d1   :  { %v1468_v63 = vadd.f32 %v3225_v18, %v1467_v31 }
 0x4d3   :  { %1589 = vst.msk [vmem:[%s3420_s18 + $0x98] sm:$0xff] %vm96_vm0, %v1468_v63 }
 0x4d8   :  { %v1470_v51 = vpop.f32.mrf.mxu2 }
 0x4d9   :  { %v1471_v3 = vadd.f32 %v3225_v18, %v1470_v51 }
 0x4db   :  { %1590 = vst.msk [vmem:[%s3420_s18 + $0xa0] sm:$0xff] %vm96_vm0, %v1471_v3 }
 0x4e0   :  { %v1473_v2 = vpop.f32.mrf.mxu2 }
 0x4e1   :  { %v1474_v58 = vadd.f32 %v3225_v18, %v1473_v2 }
 0x4e3   :  { %1591 = vst.msk [vmem:[%s3420_s18 + $0xa8] sm:$0xff] %vm96_vm0, %v1474_v58 }
 0x4e8   :  { %v1476_v52 = vpop.f32.mrf.mxu2 }
 0x4e9   :  { %v1477_v29 = vadd.f32 %v3225_v18, %v1476_v52 }
 0x4eb   :  { %1592 = vst.msk [vmem:[%s3420_s18 + $0xb0] sm:$0xff] %vm96_vm0, %v1477_v29 }
 0x4f0   :  { %v1479_v45 = vpop.f32.mrf.mxu2 }
 0x4f1   :  { %v1480_v59 = vadd.f32 %v3225_v18, %v1479_v45 }
 0x4f3   :  { %1593 = vst.msk [vmem:[%s3420_s18 + $0xb8] sm:$0xff] %vm96_vm0, %v1480_v59 }
 0x4f8   :  { %v1482_v53 = vpop.f32.mrf.mxu2 }
 0x4f9   :  { %v1483_v16 = vadd.f32 %v3225_v18, %v1482_v53 }
 0x4fb   :  { %1594 = vst.msk [vmem:[%s3420_s18 + $0xc0] sm:$0xff] %vm96_vm0, %v1483_v16 }
 0x500   :  { %v1485_v6 = vpop.f32.mrf.mxu2 }
 0x501   :  { %v1486_v17 = vadd.f32 %v3225_v18, %v1485_v6 }
 0x503   :  { %1595 = vst.msk [vmem:[%s3420_s18 + $0xc8] sm:$0xff] %vm96_vm0, %v1486_v17 }
 0x508   :  { %v1488_v56 = vpop.f32.mrf.mxu2 }
 0x509   :  { %v1489_v12 = vadd.f32 %v3225_v18, %v1488_v56 }
 0x50b   :  { %1596 = vst.msk [vmem:[%s3420_s18 + $0xd0] sm:$0xff] %vm96_vm0, %v1489_v12 }
 0x510   :  { %v1491_v23 = vpop.f32.mrf.mxu2 }
 0x511   :  { %v1492_v57 = vadd.f32 %v3225_v18, %v1491_v23 }
 0x513   :  { %1597 = vst.msk [vmem:[%s3420_s18 + $0xd8] sm:$0xff] %vm96_vm0, %v1492_v57 }
 0x518   :  { %v1494_v54 = vpop.f32.mrf.mxu2 }
 0x519   :  { %v1495_v8 = vadd.f32 %v3225_v18, %v1494_v54 }
 0x51b   :  { %1598 = vst.msk [vmem:[%s3420_s18 + $0xe0] sm:$0xff] %vm96_vm0, %v1495_v8 }
 0x520   :  { %v1497_v27 = vpop.f32.mrf.mxu2 }
 0x521   :  { %v1498_v38 = vadd.f32 %v3225_v18, %v1497_v27 }
 0x523   :  { %1599 = vst.msk [vmem:[%s3420_s18 + $0xe8] sm:$0xff] %vm96_vm0, %v1498_v38 }
 0x528   :  { %v1500_v41 = vpop.f32.mrf.mxu2 }
 0x529   :  { %v1501_v9 = vadd.f32 %v3225_v18, %v1500_v41 }
 0x52b   :  { %1600 = vst.msk [vmem:[%s3420_s18 + $0xf0] sm:$0xff] %vm96_vm0, %v1501_v9 }
 0x536   :  { %v1503_v36 = vpop.f32.mrf.mxu2 }
 0x537   :  { %v1504_v44 = vadd.f32 %v3225_v18, %v1503_v36 }
 0x539   :  { %1601 = vst.msk [vmem:[%s3420_s18 + $0xf8] sm:$0xff] %vm96_vm0, %v1504_v44 }

</bundles_post_ra>
